<compile_context>
chip_gen: v7x
topology: tpu7x:2x2x1
jax: 0.10.0
libtpu: 0.0.40
codegen_flags: <defaults>
</compile_context>

<pallas_src>
import jax
import jax.numpy as jnp
from jax.experimental import pallas as pl
from jax.experimental.pallas import tpu as pltpu


def _round_up(n: int, m: int) -> int:
    return ((n + m - 1) // m) * m


def _make_density_kernel(td: int, tf: int):
    def density_kernel(idx_ref, key_ref, out_ref, acc_ref):
        # idx_ref: (TB, TF) int32   thermometer indices (precomputed in wrapper)
        # key_ref: (TF, TD) bf16/f32  +/-1 key hypervectors (zero rows = F pad)
        # out_ref: (TB, TD) f32
        # acc_ref: (TB, TD) f32 VMEM accumulator, persists across the F axis
        f_id = pl.program_id(2)

        @pl.when(f_id == 0)
        def _init():
            acc_ref[...] = jnp.zeros_like(acc_ref)

        # Global lane (hypervector-dimension) index of this D tile, hoisted.
        d0 = pl.program_id(0) * td
        lane = jax.lax.broadcasted_iota(jnp.int32, (1, td), 1) + d0   # (1, TD)

        idx = idx_ref[...]                                  # (TB, TF) int32
        # One hoisted upcast of the key tile; inner loop is pure f32.
        k32 = key_ref[...].astype(jnp.float32)              # (TF, TD)
        colsum = jnp.sum(k32, axis=0, keepdims=True)        # (1, TD), XLU

        # Reduction over this feature tile: per feature exactly
        # compare + select(+key, 0) + add on a (TB, TD) block.
        local = jnp.zeros(acc_ref.shape, jnp.float32)
        for j in range(tf):                                 # bounded static unroll
            mask = lane < idx[:, j:j + 1]                   # (TB, TD)
            local = local + jnp.where(mask, k32[j:j + 1, :], 0.0)

        # sum_f key*(+1 if mask else -1) == 2*sum_f key*mask - sum_f key
        # (zero-padded key rows contribute 0 to both terms).
        acc_ref[...] = acc_ref[...] + 2.0 * local - colsum

        @pl.when(f_id == pl.num_programs(2) - 1)
        def _finalize():
            out_ref[...] = acc_ref[...]

    return density_kernel


def density_forward(x, key_weight, *, interpret=False):
    """Density(in_features, out_features) forward: x (B, F) -> (B, D) f32."""
    B, F = x.shape
    Fk, D = key_weight.shape
    assert F == Fk, "key weight must be (in_features, out_features)"

    # Thermometer index (torchhd value_to_index + clamp, low=0, high=1,
    # num_embeddings=D+1), computed once in the wrapper as int32.
    idx = jnp.clip(jnp.round(x.astype(jnp.float32) * D), 0.0, float(D))
    idx = idx.astype(jnp.int32)

    # --- Tile selection ------------------------------------------------------
    # D: lane-dense tiles (multiple of 128); take all of D when modest so the
    # grid collapses along D.
    Dp = _round_up(D, 128)
    if Dp <= 2048:
        td = Dp
    else:
        td = next(c for c in (2048, 1024, 512, 256, 128) if Dp % c == 0)

    # F: reduction axis (innermost grid axis). Small F: one tile covering all
    # of it. Large F: 128-wide tiles so the static unroll, code size and key
    # VMEM stay bounded as F grows.
    Fp8 = _round_up(F, 8)
    tf = Fp8 if Fp8 <= 128 else 128
    Fp = _round_up(F, tf)

    # B: as large a batch tile as keeps per-step work ~4M elements
    # (~3000 VALU cycles vs ~600 cycles per-grid-step overhead), capped at 512.
    target_elems = 4 * 1024 * 1024
    tb_cap = max(8, min(512, (target_elems // (tf * td)) // 8 * 8))
    tb = min(_round_up(B, 8), tb_cap)
    Bp = _round_up(B, tb)

    # --- Padding (padded key rows/cols are zero -> contribute nothing) -------
    if (Bp, Fp) != (B, F):
        idx = jnp.pad(idx, ((0, Bp - B), (0, Fp - F)))
    if (Fp, Dp) != (F, D):
        key_weight = jnp.pad(key_weight, ((0, Fp - F), (0, Dp - D)))

    grid = (Dp // td, Bp // tb, Fp // tf)   # F innermost (reduction)
    kernel = _make_density_kernel(td, tf)

    # VMEM: double-buffered inputs/outputs + accumulator, with headroom,
    # clamped to 48 MiB (safe under v7x's 64 MiB physical VMEM).
    need = (2 * (tb * tf * 4
                 + tf * td * key_weight.dtype.itemsize
                 + tb * td * 4)
            + tb * td * 4)
    vmem_limit = int(min(max(3 * need, 16 * 2**20), 48 * 2**20))

    out = pl.pallas_call(
        kernel,
        out_shape=jax.ShapeDtypeStruct((Bp, Dp), jnp.float32),
        grid=grid,
        in_specs=[
            pl.BlockSpec((tb, tf), lambda d, b, f: (b, f)),   # idx tile
            pl.BlockSpec((tf, td), lambda d, b, f: (f, d)),   # key tile
        ],
        out_specs=pl.BlockSpec((tb, td), lambda d, b, f: (b, d)),
        scratch_shapes=[pltpu.VMEM((tb, td), jnp.float32)],
        compiler_params=pltpu.CompilerParams(
            dimension_semantics=("parallel", "parallel", "arbitrary"),
            vmem_limit_bytes=vmem_limit),
        interpret=interpret,
    )(idx, key_weight)

    return out[:B, :D]


def density_reference(x, key_weight):
    # Pure-JAX reference of the torchhd Density forward pass.
    D = key_weight.shape[1]
    key = key_weight.astype(jnp.float32)
    x = x.astype(jnp.float32)
    idx = jnp.clip(jnp.round(x * D), 0.0, float(D))
    therm = jnp.where(
        jnp.arange(D, dtype=jnp.float32)[None, None, :] < idx[:, :, None],
        1.0, -1.0)
    return jnp.sum(therm * key[None, :, :], axis=1)


if __name__ == "__main__":
    in_features = 12     # dimensionality of the input feature vector
    out_features = 1024  # dimensionality of the hypervectors
    batch = 12           # not a multiple of 8 -> exercises batch padding

    root = jax.random.PRNGKey(0)
    k_x, k_w = jax.random.split(root)

    # Random(MAP) key hypervectors are exactly +/-1: bf16 storage is exact and
    # halves HBM traffic for the dominant (F, D) operand; compute stays f32.
    key_weight = jnp.where(
        jax.random.bernoulli(k_w, 0.5, (in_features, out_features)),
        1.0, -1.0).astype(jnp.bfloat16)

    # Inputs nominally in [low, high] = [0, 1]; values outside are clamped by
    # the thermometer index clamp, same as the PyTorch module.
    x = jax.random.uniform(k_x, (batch, in_features),
                           minval=-0.1, maxval=1.1, dtype=jnp.float32)

    out = jax.block_until_ready(density_forward(x, key_weight))
    ref = density_reference(x, key_weight)

    assert out.shape == (batch, out_features)
    assert jnp.allclose(out, ref, atol=1e-5, rtol=1e-5), "mismatch vs reference"

    print("KERNEL_OK")
</pallas_src>

<mosaic_0001>
module attributes {stable_mosaic.version = 11 : i64} {
  func.func @density_kernel(%arg0: i32, %arg1: i32, %arg2: i32, %arg3: memref<16x16xi32, #tpu.memory_space<vmem>>, %arg4: memref<16x1024xbf16, #tpu.memory_space<vmem>>, %arg5: memref<16x1024xf32, #tpu.memory_space<vmem>>, %arg6: memref<16x1024xf32, #tpu.memory_space<vmem>>) attributes {dimension_semantics = [#tpu.dimension_semantics<parallel>, #tpu.dimension_semantics<parallel>, #tpu.dimension_semantics<arbitrary>], iteration_bounds = array<i64: 1, 1, 1>, scalar_prefetch = 0 : i64, scratch_operands = 1 : i64, tpu.core_type = #tpu.core_type<tc>, window_params = [{transform_indices = @transform_0, window_bounds = array<i64: 16, 16>}, {transform_indices = @transform_1, window_bounds = array<i64: 16, 1024>}, {transform_indices = @transform_2, window_bounds = array<i64: 16, 1024>}]} {
    %c0_i32 = arith.constant 0 : i32
    %0 = arith.cmpi eq, %arg2, %c0_i32 : i32
    %1 = arith.extui %0 : i1 to i32
    %c0_i32_0 = arith.constant 0 : i32
    %2 = arith.cmpi ne, %1, %c0_i32_0 : i32
    scf.if %2 {
      %cst_28 = arith.constant 0.000000e+00 : f32
      %183 = vector.broadcast %cst_28 : f32 to vector<16x1024xf32>
      %c0_29 = arith.constant 0 : index
      %c0_30 = arith.constant 0 : index
      %184 = vector.load %arg6[%c0_29, %c0_30] : memref<16x1024xf32, #tpu.memory_space<vmem>>, vector<16x1024xf32>
      tpu.vector_store %arg6[%c0_29, %c0_30], %183 {strides = array<i32>} : memref<16x1024xf32, #tpu.memory_space<vmem>>, vector<16x1024xf32>,
    } else {
    }
    %c1024_i32 = arith.constant 1024 : i32
    %3 = arith.muli %arg0, %c1024_i32 : i32
    %4 = tpu.iota {dimensions = array<i32: 1>} : vector<1x1024xi32>
    %5 = vector.broadcast %3 : i32 to vector<1x1024xi32>
    %6 = arith.addi %4, %5 : vector<1x1024xi32>
    %c0 = arith.constant 0 : index
    %c0_1 = arith.constant 0 : index
    %7 = vector.load %arg3[%c0, %c0_1] : memref<16x16xi32, #tpu.memory_space<vmem>>, vector<16x16xi32>
    %c0_2 = arith.constant 0 : index
    %c0_3 = arith.constant 0 : index
    %8 = vector.load %arg4[%c0_2, %c0_3] : memref<16x1024xbf16, #tpu.memory_space<vmem>>, vector<16x1024xbf16>
    %9 = arith.extf %8 : vector<16x1024xbf16> to vector<16x1024xf32>
    %cst = arith.constant dense<0.000000e+00> : vector<1024xf32>
    %10 = vector.multi_reduction <add>, %9, %cst [0] : vector<16x1024xf32> to vector<1024xf32>
    %11 = vector.shape_cast %10 : vector<1024xf32> to vector<1x1024xf32>
    %cst_4 = arith.constant 0.000000e+00 : f32
    %12 = vector.broadcast %cst_4 : f32 to vector<16x1024xf32>
    %13 = vector.extract_strided_slice %7 {offsets = [0, 0], sizes = [16, 1], strides = [1, 1]} : vector<16x16xi32> to vector<16x1xi32>
    %14 = vector.broadcast %6 : vector<1x1024xi32> to vector<16x1024xi32>
    %15 = vector.broadcast %13 : vector<16x1xi32> to vector<16x1024xi32>
    %16 = arith.cmpi slt, %14, %15 : vector<16x1024xi32>
    %17 = vector.extract_strided_slice %9 {offsets = [0, 0], sizes = [1, 1024], strides = [1, 1]} : vector<16x1024xf32> to vector<1x1024xf32>
    %cst_5 = arith.constant 0.000000e+00 : f32
    %18 = vector.shape_cast %17 : vector<1x1024xf32> to vector<1x1024xf32>
    %19 = vector.broadcast %18 : vector<1x1024xf32> to vector<16x1024xf32>
    %20 = vector.broadcast %cst_5 : f32 to vector<16x1024xf32>
    %21 = arith.select %16, %19, %20 : vector<16x1024xi1>, vector<16x1024xf32>
    %22 = arith.addf %12, %21 : vector<16x1024xf32>
    %23 = vector.extract_strided_slice %7 {offsets = [0, 1], sizes = [16, 1], strides = [1, 1]} : vector<16x16xi32> to vector<16x1xi32>
    %24 = vector.broadcast %6 : vector<1x1024xi32> to vector<16x1024xi32>
    %25 = vector.broadcast %23 : vector<16x1xi32> to vector<16x1024xi32>
    %26 = arith.cmpi slt, %24, %25 : vector<16x1024xi32>
    %27 = vector.extract_strided_slice %9 {offsets = [1, 0], sizes = [1, 1024], strides = [1, 1]} : vector<16x1024xf32> to vector<1x1024xf32>
    %cst_6 = arith.constant 0.000000e+00 : f32
    %28 = vector.shape_cast %27 : vector<1x1024xf32> to vector<1x1024xf32>
    %29 = vector.broadcast %28 : vector<1x1024xf32> to vector<16x1024xf32>
    %30 = vector.broadcast %cst_6 : f32 to vector<16x1024xf32>
    %31 = arith.select %26, %29, %30 : vector<16x1024xi1>, vector<16x1024xf32>
    %32 = arith.addf %22, %31 : vector<16x1024xf32>
    %33 = vector.extract_strided_slice %7 {offsets = [0, 2], sizes = [16, 1], strides = [1, 1]} : vector<16x16xi32> to vector<16x1xi32>
    %34 = vector.broadcast %6 : vector<1x1024xi32> to vector<16x1024xi32>
    %35 = vector.broadcast %33 : vector<16x1xi32> to vector<16x1024xi32>
    %36 = arith.cmpi slt, %34, %35 : vector<16x1024xi32>
    %37 = vector.extract_strided_slice %9 {offsets = [2, 0], sizes = [1, 1024], strides = [1, 1]} : vector<16x1024xf32> to vector<1x1024xf32>
    %cst_7 = arith.constant 0.000000e+00 : f32
    %38 = vector.shape_cast %37 : vector<1x1024xf32> to vector<1x1024xf32>
    %39 = vector.broadcast %38 : vector<1x1024xf32> to vector<16x1024xf32>
    %40 = vector.broadcast %cst_7 : f32 to vector<16x1024xf32>
    %41 = arith.select %36, %39, %40 : vector<16x1024xi1>, vector<16x1024xf32>
    %42 = arith.addf %32, %41 : vector<16x1024xf32>
    %43 = vector.extract_strided_slice %7 {offsets = [0, 3], sizes = [16, 1], strides = [1, 1]} : vector<16x16xi32> to vector<16x1xi32>
    %44 = vector.broadcast %6 : vector<1x1024xi32> to vector<16x1024xi32>
    %45 = vector.broadcast %43 : vector<16x1xi32> to vector<16x1024xi32>
    %46 = arith.cmpi slt, %44, %45 : vector<16x1024xi32>
    %47 = vector.extract_strided_slice %9 {offsets = [3, 0], sizes = [1, 1024], strides = [1, 1]} : vector<16x1024xf32> to vector<1x1024xf32>
    %cst_8 = arith.constant 0.000000e+00 : f32
    %48 = vector.shape_cast %47 : vector<1x1024xf32> to vector<1x1024xf32>
    %49 = vector.broadcast %48 : vector<1x1024xf32> to vector<16x1024xf32>
    %50 = vector.broadcast %cst_8 : f32 to vector<16x1024xf32>
    %51 = arith.select %46, %49, %50 : vector<16x1024xi1>, vector<16x1024xf32>
    %52 = arith.addf %42, %51 : vector<16x1024xf32>
    %53 = vector.extract_strided_slice %7 {offsets = [0, 4], sizes = [16, 1], strides = [1, 1]} : vector<16x16xi32> to vector<16x1xi32>
    %54 = vector.broadcast %6 : vector<1x1024xi32> to vector<16x1024xi32>
    %55 = vector.broadcast %53 : vector<16x1xi32> to vector<16x1024xi32>
    %56 = arith.cmpi slt, %54, %55 : vector<16x1024xi32>
    %57 = vector.extract_strided_slice %9 {offsets = [4, 0], sizes = [1, 1024], strides = [1, 1]} : vector<16x1024xf32> to vector<1x1024xf32>
    %cst_9 = arith.constant 0.000000e+00 : f32
    %58 = vector.shape_cast %57 : vector<1x1024xf32> to vector<1x1024xf32>
    %59 = vector.broadcast %58 : vector<1x1024xf32> to vector<16x1024xf32>
    %60 = vector.broadcast %cst_9 : f32 to vector<16x1024xf32>
    %61 = arith.select %56, %59, %60 : vector<16x1024xi1>, vector<16x1024xf32>
    %62 = arith.addf %52, %61 : vector<16x1024xf32>
    %63 = vector.extract_strided_slice %7 {offsets = [0, 5], sizes = [16, 1], strides = [1, 1]} : vector<16x16xi32> to vector<16x1xi32>
    %64 = vector.broadcast %6 : vector<1x1024xi32> to vector<16x1024xi32>
    %65 = vector.broadcast %63 : vector<16x1xi32> to vector<16x1024xi32>
    %66 = arith.cmpi slt, %64, %65 : vector<16x1024xi32>
    %67 = vector.extract_strided_slice %9 {offsets = [5, 0], sizes = [1, 1024], strides = [1, 1]} : vector<16x1024xf32> to vector<1x1024xf32>
    %cst_10 = arith.constant 0.000000e+00 : f32
    %68 = vector.shape_cast %67 : vector<1x1024xf32> to vector<1x1024xf32>
    %69 = vector.broadcast %68 : vector<1x1024xf32> to vector<16x1024xf32>
    %70 = vector.broadcast %cst_10 : f32 to vector<16x1024xf32>
    %71 = arith.select %66, %69, %70 : vector<16x1024xi1>, vector<16x1024xf32>
    %72 = arith.addf %62, %71 : vector<16x1024xf32>
    %73 = vector.extract_strided_slice %7 {offsets = [0, 6], sizes = [16, 1], strides = [1, 1]} : vector<16x16xi32> to vector<16x1xi32>
    %74 = vector.broadcast %6 : vector<1x1024xi32> to vector<16x1024xi32>
    %75 = vector.broadcast %73 : vector<16x1xi32> to vector<16x1024xi32>
    %76 = arith.cmpi slt, %74, %75 : vector<16x1024xi32>
    %77 = vector.extract_strided_slice %9 {offsets = [6, 0], sizes = [1, 1024], strides = [1, 1]} : vector<16x1024xf32> to vector<1x1024xf32>
    %cst_11 = arith.constant 0.000000e+00 : f32
    %78 = vector.shape_cast %77 : vector<1x1024xf32> to vector<1x1024xf32>
    %79 = vector.broadcast %78 : vector<1x1024xf32> to vector<16x1024xf32>
    %80 = vector.broadcast %cst_11 : f32 to vector<16x1024xf32>
    %81 = arith.select %76, %79, %80 : vector<16x1024xi1>, vector<16x1024xf32>
    %82 = arith.addf %72, %81 : vector<16x1024xf32>
    %83 = vector.extract_strided_slice %7 {offsets = [0, 7], sizes = [16, 1], strides = [1, 1]} : vector<16x16xi32> to vector<16x1xi32>
    %84 = vector.broadcast %6 : vector<1x1024xi32> to vector<16x1024xi32>
    %85 = vector.broadcast %83 : vector<16x1xi32> to vector<16x1024xi32>
    %86 = arith.cmpi slt, %84, %85 : vector<16x1024xi32>
    %87 = vector.extract_strided_slice %9 {offsets = [7, 0], sizes = [1, 1024], strides = [1, 1]} : vector<16x1024xf32> to vector<1x1024xf32>
    %cst_12 = arith.constant 0.000000e+00 : f32
    %88 = vector.shape_cast %87 : vector<1x1024xf32> to vector<1x1024xf32>
    %89 = vector.broadcast %88 : vector<1x1024xf32> to vector<16x1024xf32>
    %90 = vector.broadcast %cst_12 : f32 to vector<16x1024xf32>
    %91 = arith.select %86, %89, %90 : vector<16x1024xi1>, vector<16x1024xf32>
    %92 = arith.addf %82, %91 : vector<16x1024xf32>
    %93 = vector.extract_strided_slice %7 {offsets = [0, 8], sizes = [16, 1], strides = [1, 1]} : vector<16x16xi32> to vector<16x1xi32>
    %94 = vector.broadcast %6 : vector<1x1024xi32> to vector<16x1024xi32>
    %95 = vector.broadcast %93 : vector<16x1xi32> to vector<16x1024xi32>
    %96 = arith.cmpi slt, %94, %95 : vector<16x1024xi32>
    %97 = vector.extract_strided_slice %9 {offsets = [8, 0], sizes = [1, 1024], strides = [1, 1]} : vector<16x1024xf32> to vector<1x1024xf32>
    %cst_13 = arith.constant 0.000000e+00 : f32
    %98 = vector.shape_cast %97 : vector<1x1024xf32> to vector<1x1024xf32>
    %99 = vector.broadcast %98 : vector<1x1024xf32> to vector<16x1024xf32>
    %100 = vector.broadcast %cst_13 : f32 to vector<16x1024xf32>
    %101 = arith.select %96, %99, %100 : vector<16x1024xi1>, vector<16x1024xf32>
    %102 = arith.addf %92, %101 : vector<16x1024xf32>
    %103 = vector.extract_strided_slice %7 {offsets = [0, 9], sizes = [16, 1], strides = [1, 1]} : vector<16x16xi32> to vector<16x1xi32>
    %104 = vector.broadcast %6 : vector<1x1024xi32> to vector<16x1024xi32>
    %105 = vector.broadcast %103 : vector<16x1xi32> to vector<16x1024xi32>
    %106 = arith.cmpi slt, %104, %105 : vector<16x1024xi32>
    %107 = vector.extract_strided_slice %9 {offsets = [9, 0], sizes = [1, 1024], strides = [1, 1]} : vector<16x1024xf32> to vector<1x1024xf32>
    %cst_14 = arith.constant 0.000000e+00 : f32
    %108 = vector.shape_cast %107 : vector<1x1024xf32> to vector<1x1024xf32>
    %109 = vector.broadcast %108 : vector<1x1024xf32> to vector<16x1024xf32>
    %110 = vector.broadcast %cst_14 : f32 to vector<16x1024xf32>
    %111 = arith.select %106, %109, %110 : vector<16x1024xi1>, vector<16x1024xf32>
    %112 = arith.addf %102, %111 : vector<16x1024xf32>
    %113 = vector.extract_strided_slice %7 {offsets = [0, 10], sizes = [16, 1], strides = [1, 1]} : vector<16x16xi32> to vector<16x1xi32>
    %114 = vector.broadcast %6 : vector<1x1024xi32> to vector<16x1024xi32>
    %115 = vector.broadcast %113 : vector<16x1xi32> to vector<16x1024xi32>
    %116 = arith.cmpi slt, %114, %115 : vector<16x1024xi32>
    %117 = vector.extract_strided_slice %9 {offsets = [10, 0], sizes = [1, 1024], strides = [1, 1]} : vector<16x1024xf32> to vector<1x1024xf32>
    %cst_15 = arith.constant 0.000000e+00 : f32
    %118 = vector.shape_cast %117 : vector<1x1024xf32> to vector<1x1024xf32>
    %119 = vector.broadcast %118 : vector<1x1024xf32> to vector<16x1024xf32>
    %120 = vector.broadcast %cst_15 : f32 to vector<16x1024xf32>
    %121 = arith.select %116, %119, %120 : vector<16x1024xi1>, vector<16x1024xf32>
    %122 = arith.addf %112, %121 : vector<16x1024xf32>
    %123 = vector.extract_strided_slice %7 {offsets = [0, 11], sizes = [16, 1], strides = [1, 1]} : vector<16x16xi32> to vector<16x1xi32>
    %124 = vector.broadcast %6 : vector<1x1024xi32> to vector<16x1024xi32>
    %125 = vector.broadcast %123 : vector<16x1xi32> to vector<16x1024xi32>
    %126 = arith.cmpi slt, %124, %125 : vector<16x1024xi32>
    %127 = vector.extract_strided_slice %9 {offsets = [11, 0], sizes = [1, 1024], strides = [1, 1]} : vector<16x1024xf32> to vector<1x1024xf32>
    %cst_16 = arith.constant 0.000000e+00 : f32
    %128 = vector.shape_cast %127 : vector<1x1024xf32> to vector<1x1024xf32>
    %129 = vector.broadcast %128 : vector<1x1024xf32> to vector<16x1024xf32>
    %130 = vector.broadcast %cst_16 : f32 to vector<16x1024xf32>
    %131 = arith.select %126, %129, %130 : vector<16x1024xi1>, vector<16x1024xf32>
    %132 = arith.addf %122, %131 : vector<16x1024xf32>
    %133 = vector.extract_strided_slice %7 {offsets = [0, 12], sizes = [16, 1], strides = [1, 1]} : vector<16x16xi32> to vector<16x1xi32>
    %134 = vector.broadcast %6 : vector<1x1024xi32> to vector<16x1024xi32>
    %135 = vector.broadcast %133 : vector<16x1xi32> to vector<16x1024xi32>
    %136 = arith.cmpi slt, %134, %135 : vector<16x1024xi32>
    %137 = vector.extract_strided_slice %9 {offsets = [12, 0], sizes = [1, 1024], strides = [1, 1]} : vector<16x1024xf32> to vector<1x1024xf32>
    %cst_17 = arith.constant 0.000000e+00 : f32
    %138 = vector.shape_cast %137 : vector<1x1024xf32> to vector<1x1024xf32>
    %139 = vector.broadcast %138 : vector<1x1024xf32> to vector<16x1024xf32>
    %140 = vector.broadcast %cst_17 : f32 to vector<16x1024xf32>
    %141 = arith.select %136, %139, %140 : vector<16x1024xi1>, vector<16x1024xf32>
    %142 = arith.addf %132, %141 : vector<16x1024xf32>
    %143 = vector.extract_strided_slice %7 {offsets = [0, 13], sizes = [16, 1], strides = [1, 1]} : vector<16x16xi32> to vector<16x1xi32>
    %144 = vector.broadcast %6 : vector<1x1024xi32> to vector<16x1024xi32>
    %145 = vector.broadcast %143 : vector<16x1xi32> to vector<16x1024xi32>
    %146 = arith.cmpi slt, %144, %145 : vector<16x1024xi32>
    %147 = vector.extract_strided_slice %9 {offsets = [13, 0], sizes = [1, 1024], strides = [1, 1]} : vector<16x1024xf32> to vector<1x1024xf32>
    %cst_18 = arith.constant 0.000000e+00 : f32
    %148 = vector.shape_cast %147 : vector<1x1024xf32> to vector<1x1024xf32>
    %149 = vector.broadcast %148 : vector<1x1024xf32> to vector<16x1024xf32>
    %150 = vector.broadcast %cst_18 : f32 to vector<16x1024xf32>
    %151 = arith.select %146, %149, %150 : vector<16x1024xi1>, vector<16x1024xf32>
    %152 = arith.addf %142, %151 : vector<16x1024xf32>
    %153 = vector.extract_strided_slice %7 {offsets = [0, 14], sizes = [16, 1], strides = [1, 1]} : vector<16x16xi32> to vector<16x1xi32>
    %154 = vector.broadcast %6 : vector<1x1024xi32> to vector<16x1024xi32>
    %155 = vector.broadcast %153 : vector<16x1xi32> to vector<16x1024xi32>
    %156 = arith.cmpi slt, %154, %155 : vector<16x1024xi32>
    %157 = vector.extract_strided_slice %9 {offsets = [14, 0], sizes = [1, 1024], strides = [1, 1]} : vector<16x1024xf32> to vector<1x1024xf32>
    %cst_19 = arith.constant 0.000000e+00 : f32
    %158 = vector.shape_cast %157 : vector<1x1024xf32> to vector<1x1024xf32>
    %159 = vector.broadcast %158 : vector<1x1024xf32> to vector<16x1024xf32>
    %160 = vector.broadcast %cst_19 : f32 to vector<16x1024xf32>
    %161 = arith.select %156, %159, %160 : vector<16x1024xi1>, vector<16x1024xf32>
    %162 = arith.addf %152, %161 : vector<16x1024xf32>
    %163 = vector.extract_strided_slice %7 {offsets = [0, 15], sizes = [16, 1], strides = [1, 1]} : vector<16x16xi32> to vector<16x1xi32>
    %164 = vector.broadcast %6 : vector<1x1024xi32> to vector<16x1024xi32>
    %165 = vector.broadcast %163 : vector<16x1xi32> to vector<16x1024xi32>
    %166 = arith.cmpi slt, %164, %165 : vector<16x1024xi32>
    %167 = vector.extract_strided_slice %9 {offsets = [15, 0], sizes = [1, 1024], strides = [1, 1]} : vector<16x1024xf32> to vector<1x1024xf32>
    %cst_20 = arith.constant 0.000000e+00 : f32
    %168 = vector.shape_cast %167 : vector<1x1024xf32> to vector<1x1024xf32>
    %169 = vector.broadcast %168 : vector<1x1024xf32> to vector<16x1024xf32>
    %170 = vector.broadcast %cst_20 : f32 to vector<16x1024xf32>
    %171 = arith.select %166, %169, %170 : vector<16x1024xi1>, vector<16x1024xf32>
    %172 = arith.addf %162, %171 : vector<16x1024xf32>
    %c0_21 = arith.constant 0 : index
    %c0_22 = arith.constant 0 : index
    %173 = vector.load %arg6[%c0_21, %c0_22] : memref<16x1024xf32, #tpu.memory_space<vmem>>, vector<16x1024xf32>
    %cst_23 = arith.constant 2.000000e+00 : f32
    %174 = vector.broadcast %cst_23 : f32 to vector<16x1024xf32>
    %175 = arith.mulf %174, %172 : vector<16x1024xf32>
    %176 = arith.addf %173, %175 : vector<16x1024xf32>
    %177 = vector.broadcast %11 : vector<1x1024xf32> to vector<16x1024xf32>
    %178 = arith.subf %176, %177 : vector<16x1024xf32>
    %c0_24 = arith.constant 0 : index
    %c0_25 = arith.constant 0 : index
    %179 = vector.load %arg6[%c0_24, %c0_25] : memref<16x1024xf32, #tpu.memory_space<vmem>>, vector<16x1024xf32>
    tpu.vector_store %arg6[%c0_24, %c0_25], %178 {strides = array<i32>} : memref<16x1024xf32, #tpu.memory_space<vmem>>, vector<16x1024xf32>,
    %c0_i32_26 = arith.constant 0 : i32
    %180 = arith.cmpi eq, %arg2, %c0_i32_26 : i32
    %181 = arith.extui %180 : i1 to i32
    %c0_i32_27 = arith.constant 0 : i32
    %182 = arith.cmpi ne, %181, %c0_i32_27 : i32
    scf.if %182 {
      %c0_28 = arith.constant 0 : index
      %c0_29 = arith.constant 0 : index
      %183 = vector.load %arg6[%c0_28, %c0_29] : memref<16x1024xf32, #tpu.memory_space<vmem>>, vector<16x1024xf32>
      %c0_30 = arith.constant 0 : index
      %c0_31 = arith.constant 0 : index
      %184 = vector.load %arg5[%c0_30, %c0_31] : memref<16x1024xf32, #tpu.memory_space<vmem>>, vector<16x1024xf32>
      tpu.vector_store %arg5[%c0_30, %c0_31], %183 {strides = array<i32>} : memref<16x1024xf32, #tpu.memory_space<vmem>>, vector<16x1024xf32>,
    } else {
    }
    return
  }
  func.func @transform_0(%arg0: i32, %arg1: i32, %arg2: i32) -> (i32, i32) {
    %c0_i32 = arith.constant 0 : i32
    return %arg1, %arg2 : i32, i32
  }
  func.func @transform_1(%arg0: i32, %arg1: i32, %arg2: i32) -> (i32, i32) {
    %c0_i32 = arith.constant 0 : i32
    return %arg2, %arg0 : i32, i32
  }
  func.func @transform_2(%arg0: i32, %arg1: i32, %arg2: i32) -> (i32, i32) {
    %c0_i32 = arith.constant 0 : i32
    return %arg1, %arg0 : i32, i32
  }
}

</mosaic_0001>

<bundles_post_ra>
// kernel: tpu_custom_call.1
= control target key start
LH: loop header
LB: loop body
LE: loop exit
PB: predicated region body
PF: predicated region fallthrough
CT: control target
= control target key end

     0   :  { %7 = vsyncpa [#allocation4], 0  ;;  %s3382_s0 = inlined_call_operand.hbm [shape: s32[16,16], index: 0, kind: input, shape index: {}]   ;;  %s3383_s1 = inlined_call_operand.hbm [shape: bf16[16,1024], index: 1, kind: input, shape index: {}]   ;;  %s3384_s2 = inlined_call_operand.hbm [shape: f32[16,1024], index: 2, kind: output, shape index: {}]  }
   0x1   :  { %8 = vsyncpa [#allocation7], 0 }
   0x2   :  { %9 = vsyncpa [#allocation5], 0  ;;  %s1793_s9 = smov [#allocation3]   ;;  %s1721_s13 = scalar_lea.hbm %s3382_s0, 256 }
   0x3   :  { %s15_s10 = sshll.u32 %s1793_s9, 4  ;;  %p1722_p0 = scmp.ne.s32.totalorder %s3382_s0, %s1721_s13  ;;  %s16_s10 = int_to_ptr.vmem [resolvable:$true] %s15_s10 }
   0x4   :  { %p1725_p1 = scmp.lt.u32.totalorder %s1721_s13, %s3382_s0 }
   0x6   :  { %p1727_p2 = pnand %p1725_p1, %p1722_p0 }
   0x8   :  { %1730 = shalt.err (!%p1727_p2)
}
   0x9   :  { %s1731_s18 = scalar_lea.vmem %s16_s10, 256  ;;  %p1736_p4 = scmp.lt.s32.totalorder %s16_s10, %s16_s10 }
   0xa   :  { %p1732_p3 = scmp.ne.s32.totalorder %s16_s10, %s1731_s18  ;;  %p1737_p5 = scmp.lt.s32.totalorder %s1731_s18, %s1731_s18 }
   0xc   :  { %p1738_p6 = por %p1737_p5, %p1736_p4 }
   0xe   :  { %p1739_p7 = pnand %p1738_p6, %p1732_p3 }
  0x10   :  { %1742 = shalt.err (!%p1739_p7)
}
  0x11   :  { %s1794_s19 = smov 128   ;;  %s1795_s20 = smov 8  }
  0x12   :  { %21 = dma.hbm_to_vmem [thread:$0]  %s3382_s0, 256, %s16_s10, [#allocation4], %s1794_s19, %s1794_s19, %s1795_s20  }
  0x13   :  { %s1796_s23 = smov [#allocation6]   ;;  %s1743_s27 = scalar_lea.hbm %s3383_s1, 1024 }
  0x14   :  { %s27_s24 = sshll.u32 %s1796_s23, 4  ;;  %p1744_p8 = scmp.ne.s32.totalorder %s3383_s1, %s1743_s27  ;;  %s28_s24 = int_to_ptr.vmem [resolvable:$true] %s27_s24 }
  0x15   :  { %p1747_p9 = scmp.lt.u32.totalorder %s1743_s27, %s3383_s1 }
  0x17   :  { %p1749_p10 = pnand %p1747_p9, %p1744_p8 }
  0x19   :  { %1752 = shalt.err (!%p1749_p10)
}
  0x1a   :  { %s1753_s4 = scalar_lea.vmem %s28_s24, 1024  ;;  %p1758_p12 = scmp.lt.s32.totalorder %s28_s24, %s28_s24 }
  0x1b   :  { %p1754_p11 = scmp.ne.s32.totalorder %s28_s24, %s1753_s4  ;;  %p1759_p13 = scmp.lt.s32.totalorder %s1753_s4, %s1753_s4 }
  0x1d   :  { %p1760_p0 = por %p1759_p13, %p1758_p12 }
  0x1f   :  { %p1761_p1 = pnand %p1760_p0, %p1754_p11 }
  0x21   :  { %1764 = shalt.err (!%p1761_p1)
}
  0x22   :  { %s1797_s0 = smov 512   ;;  %s1798_s5 = smov 32  }
  0x23   :  { %33 = dma.hbm_to_vmem [thread:$0]  %s3383_s1, 1024, %s28_s24, [#allocation7], %s1797_s0, %s1797_s0, %s1798_s5  }
  0x24   :  { %1787 = dma.done.wait [#allocation4], 256  }
  0x25   :  { %1788 = vsyncadd [#allocation4], 4294967040 }
  0x26   :  { %1789 = dma.done.wait [#allocation7], 1024  }
  0x27   :  { %1790 = vsyncadd [#allocation7], 4294966272  ;;  %v1799_v0 = vmov 1   ;;  %v1800_v1 = vmov 0   ;;  %v1857_v2 = vld [vmem:[#allocation3] sm:$0xff]  ;;  %v1861_v3 = vld [vmem:[#allocation3 + $0x8] sm:$0xff]  ;;  %v61_v18 = vlaneseq }
  0x28   :  { %1696 = vset.pattern.permute.xlu1 %v1799_v0  ;;  %1695 = vset.pattern.permute.xlu0 %v1800_v1  ;;  %v1801_v4 = vmov 2   ;;  %v1802_v5 = vmov 3   ;;  %v1803_v6 = vmov 4   ;;  %v1804_v7 = vmov 5   ;;  %v81_v21 = vld [vmem:[#allocation6] sm:$0xff]  ;;  %v82_v22 = vld [vmem:[#allocation6 + $0x8] sm:$0xff] }
  0x29   :  { %248 = vperm.xlu1 %1696, %v1857_v2   ;;  %162 = vperm.xlu0 %1695, %v1857_v2   ;;  %v1805_v8 = vmov 6   ;;  %v1806_v9 = vmov 8   ;;  %v1807_v10 = vmov 9   ;;  %v1808_v11 = vmov 7   ;;  %v83_v23 = vld [vmem:[#allocation6 + $0x10] sm:$0xff]  ;;  %v84_v24 = vld [vmem:[#allocation6 + $0x18] sm:$0xff] }
  0x2a   :  { %v1809_v12 = vmov 11   ;;  %v1810_v13 = vmov 12   ;;  %v1811_v14 = vmov 14   ;;  %v1812_v15 = vmov 15   ;;  %s1815_s1 = smov [#allocation8]  }
  0x2b   :  { %v1813_v16 = vmov 10   ;;  %v1814_v17 = vmov 13   ;;  %v1893_v19 = vshrl.u32 %v61_v18, 7  ;;  %v1895_v20 = vand.u32 127, %v61_v18  ;;  %s1657_s8 = sshll.u32 %s1815_s1, 4  ;;  %s1658_s8 = int_to_ptr.vmem [resolvable:$true] %s1657_s8 }
  0x2c   :  { %v1897_v25 = vunpack.c.l.bf16 %v81_v21  ;;  %v1899_v26 = vunpack.c.h.bf16 %v81_v21  ;;  %v1907_v29 = vunpack.c.l.bf16 %v82_v22  ;;  %v1909_v30 = vunpack.c.h.bf16 %v82_v22  ;;  %s1765_s9 = scalar_lea.vmem %s1658_s8, 2048  ;;  %p1770_p3 = scmp.lt.s32.totalorder %s1658_s8, %s1658_s8 }
  0x2d   :  { %251 = vperm.xlu1 %1696, %v1861_v3   ;;  %165 = vperm.xlu0 %1695, %v1861_v3   ;;  %v1902_v27 = vsub.s32 1, %v1893_v19  ;;  %v1905_v28 = vadd.s32 128, %v1895_v20  ;;  %v1911_v31 = vunpack.c.l.bf16 %v83_v23  ;;  %v1913_v32 = vunpack.c.h.bf16 %v83_v23  ;;  %p1766_p2 = scmp.ne.s32.totalorder %s1658_s8, %s1765_s9  ;;  %p1771_p4 = scmp.lt.s32.totalorder %s1765_s9, %s1765_s9 }
  0x2e   :  { %3492 = vst [vmem:[#allocation12_spill] sm:$0xff] %v1897_v25  ;;  %3493 = vst [vmem:[#allocation13_spill] sm:$0xff] %v1899_v26  ;;  %v1915_v33 = vunpack.c.l.bf16 %v84_v24  ;;  %v1917_v34 = vunpack.c.h.bf16 %v84_v24  ;;  %v1920_v35 = vsub.s32 0, %v1893_v19  ;;  %v1923_v36 = vadd.s32 256, %v1895_v20 }
  0x2f   :  { %3494 = vst [vmem:[#allocation14_spill] sm:$0xff] %v1907_v29  ;;  %3495 = vst [vmem:[#allocation15_spill] sm:$0xff] %v1909_v30  ;;  %v1926_v37 = vadd.s32 384, %v1895_v20  ;;  %v1929_v38 = vadd.s32 512, %v1895_v20  ;;  %v1932_v39 = vadd.s32 640, %v1895_v20  ;;  %v1935_v40 = vadd.s32 768, %v1895_v20  ;;  %p1772_p5 = por %p1771_p4, %p1770_p3 }
  0x30   :  { %3496 = vst [vmem:[#allocation16_spill] sm:$0xff] %v1911_v31  ;;  %3497 = vst [vmem:[#allocation17_spill] sm:$0xff] %v1913_v32  ;;  %v1938_v41 = vadd.s32 896, %v1895_v20  ;;  %v1942_v42 = vrot.slane %v1897_v25, %v1902_v27  ;;  %v1946_v43 = vrot.slane %v1899_v26, %v1902_v27  ;;  %v1950_v44 = vrot.slane %v1907_v29, %v1902_v27 }
  0x31   :  { %1698 = vset.pattern.permute.xlu1 %v1801_v4  ;;  %1697 = vset.pattern.permute.xlu0 %v1801_v4  ;;  %3498 = vst [vmem:[#allocation18_spill] sm:$0xff] %v1915_v33  ;;  %3499 = vst [vmem:[#allocation19_spill] sm:$0xff] %v1917_v34  ;;  %v1954_v45 = vrot.slane %v1909_v30, %v1902_v27  ;;  %v1958_v46 = vrot.slane %v1911_v31, %v1902_v27  ;;  %v1961_v47 = vsub.s32 2, %v1893_v19  ;;  %p1773_p6 = pnand %p1772_p5, %p1766_p2 }
  0x32   :  { %337 = vperm.xlu1 %1698, %v1861_v3   ;;  %334 = vperm.xlu0 %1697, %v1857_v2   ;;  %3500 = vst [vmem:[#allocation20_spill] sm:$0xff] %v1929_v38  ;;  %3501 = vst [vmem:[#allocation21_spill] sm:$0xff] %v1932_v39  ;;  %v1965_v48 = vrot.slane %v1913_v32, %v1902_v27  ;;  %v1969_v49 = vrot.slane %v1915_v33, %v1902_v27  ;;  %v1992_v55 = vsub.s32 3, %v1893_v19 }
  0x33   :  { %3502 = vst [vmem:[#allocation22_spill] sm:$0xff] %v1935_v40  ;;  %v1973_v50 = vrot.slane %v1917_v34, %v1902_v27  ;;  %v1977_v51 = vrot.slane %v1897_v25, %v1920_v35  ;;  %v1981_v52 = vrot.slane %v1899_v26, %v1920_v35  ;;  %v1985_v53 = vrot.slane %v1907_v29, %v1920_v35 }
  0x34   :  { %v1989_v54 = vrot.slane %v1909_v30, %v1920_v35  ;;  %v1996_v56 = vrot.slane %v1911_v31, %v1920_v35  ;;  %v2000_v57 = vrot.slane %v1913_v32, %v1920_v35  ;;  %v2004_v58 = vrot.slane %v1915_v33, %v1920_v35 }
  0x35   :  { %v2008_v59 = vrot.slane %v1917_v34, %v1920_v35  ;;  %v2012_v60 = vrot.slane %v1897_v25, %v1961_v47  ;;  %v2016_v61 = vrot.slane %v1899_v26, %v1961_v47  ;;  %v2020_v62 = vrot.slane %v1907_v29, %v1961_v47 }
  0x36   :  { %1699 = vset.pattern.permute.xlu1 %v1802_v5  ;;  %1700 = vset.pattern.permute.xlu0 %v1802_v5  ;;  %v2023_v63 = vsub.s32 4, %v1893_v19  ;;  %v2027_v0 = vrot.slane %v1909_v30, %v1961_v47  ;;  %v2031_v1 = vrot.slane %v1911_v31, %v1961_v47  ;;  %v2043_v4 = vrot.slane %v1917_v34, %v1961_v47 }
  0x37   :  { %420 = vperm.xlu1 %1699, %v1857_v2   ;;  %423 = vperm.xlu0 %1700, %v1861_v3   ;;  %v2047_v5 = vrot.slane %v1897_v25, %v1992_v55 }
  0x38   :  { %3503 = vst [vmem:[#allocation23_spill] sm:$0xff] %v2023_v63  ;;  %v2097_v18 = vrot.slane %v1909_v30, %v2023_v63  ;;  %v2101_v21 = vrot.slane %v1911_v31, %v2023_v63  ;;  %v2105_v22 = vrot.slane %v1913_v32, %v2023_v63  ;;  %v2109_v23 = vrot.slane %v1915_v33, %v2023_v63 }
  0x39   :  { %v2113_v24 = vrot.slane %v1917_v34, %v2023_v63 }
  0x3a   :  { %3514 = vst [vmem:[#allocation34_spill] sm:$0xff] %v2097_v18  ;;  %3515 = vst [vmem:[#allocation35_spill] sm:$0xff] %v2101_v21 }
  0x3b   :  { %1701 = vset.pattern.permute.xlu1 %v1803_v6  ;;  %1702 = vset.pattern.permute.xlu0 %v1804_v7  ;;  %v2051_v6 = vrot.slane %v1899_v26, %v1992_v55  ;;  %3516 = vst [vmem:[#allocation36_spill] sm:$0xff] %v2105_v22  ;;  %3517 = vst [vmem:[#allocation37_spill] sm:$0xff] %v2109_v23  ;;  %v86_v23 = vld [vmem:[#allocation6 + $0x28] sm:$0xff] }
  0x3c   :  { %506 = vperm.xlu1 %1701, %v1857_v2   ;;  %592 = vperm.xlu0 %1702, %v1857_v2   ;;  %3518 = vst [vmem:[#allocation38_spill] sm:$0xff] %v2113_v24 }
  0x40   :  { %509 = vperm.xlu1 %1701, %v1861_v3   ;;  %1705 = vset.pattern.permute.xlu0 %v1805_v8 }
  0x41   :  { %681 = vperm.xlu0 %1705, %v1861_v3  }
  0x44   :  { %1703 = vset.pattern.permute.xlu1 %v1804_v7  ;;  %v2054_v7 = vsub.s32 5, %v1893_v19 }
  0x45   :  { %595 = vperm.xlu1 %1703, %v1861_v3   ;;  %1707 = vset.pattern.permute.xlu0 %v1806_v9 }
  0x46   :  { %850 = vperm.xlu0 %1707, %v1857_v2   ;;  %3504 = vst [vmem:[#allocation24_spill] sm:$0xff] %v2054_v7  ;;  %v2121_v18 = vrot.slane %v1899_v26, %v2054_v7  ;;  %v2125_v21 = vrot.slane %v1907_v29, %v2054_v7  ;;  %v2129_v22 = vrot.slane %v1909_v30, %v2054_v7 }
  0x47   :  { %v2137_v24 = vrot.slane %v1913_v32, %v2054_v7 }
  0x48   :  { %3520 = vst [vmem:[#allocation40_spill] sm:$0xff] %v2121_v18  ;;  %3521 = vst [vmem:[#allocation41_spill] sm:$0xff] %v2125_v21  ;;  %v2145_v18 = vrot.slane %v1917_v34, %v2054_v7 }
  0x49   :  { %1704 = vset.pattern.permute.xlu1 %v1805_v8  ;;  %v2058_v8 = vrot.slane %v1907_v29, %v1992_v55  ;;  %3522 = vst [vmem:[#allocation42_spill] sm:$0xff] %v2129_v22  ;;  %3524 = vst [vmem:[#allocation44_spill] sm:$0xff] %v2137_v24  ;;  %v85_v22 = vld [vmem:[#allocation6 + $0x20] sm:$0xff] }
  0x4a   :  { %678 = vperm.xlu1 %1704, %v1857_v2   ;;  %1710 = vset.pattern.permute.xlu0 %v1807_v10  ;;  %3526 = vst [vmem:[#allocation46_spill] sm:$0xff] %v2145_v18  ;;  %v87_v18 = vld [vmem:[#allocation6 + $0x30] sm:$0xff] }
  0x4b   :  { %939 = vperm.xlu0 %1710, %v1861_v3  }
  0x4e   :  { %1706 = vset.pattern.permute.xlu1 %v1808_v11  ;;  %v2070_v11 = vrot.slane %v1913_v32, %v1992_v55 }
  0x4f   :  { %764 = vperm.xlu1 %1706, %v1857_v2   ;;  %1712 = vset.pattern.permute.xlu0 %v1809_v12 }
  0x50   :  { %1108 = vperm.xlu0 %1712, %v1857_v2   ;;  %3507 = vst [vmem:[#allocation27_spill] sm:$0xff] %v2070_v11  ;;  %v2192_v11 = vunpack.c.h.bf16 %v87_v18 }
  0x52   :  { %3541 = vst [vmem:[#allocation61_spill] sm:$0xff] %v2192_v11 }
  0x53   :  { %767 = vperm.xlu1 %1706, %v1861_v3  }
  0x54   :  { %1715 = vset.pattern.permute.xlu0 %v1810_v13 }
  0x55   :  { %1197 = vperm.xlu0 %1715, %v1861_v3  }
  0x57   :  { %1708 = vset.pattern.permute.xlu1 %v1806_v9  ;;  %v2062_v9 = vrot.slane %v1909_v30, %v1992_v55 }
  0x58   :  { %853 = vperm.xlu1 %1708, %v1861_v3  }
  0x59   :  { %1717 = vset.pattern.permute.xlu0 %v1811_v14  ;;  %3505 = vst [vmem:[#allocation25_spill] sm:$0xff] %v2062_v9 }
  0x5a   :  { %1366 = vperm.xlu0 %1717, %v1857_v2  }
  0x5c   :  { %1709 = vset.pattern.permute.xlu1 %v1807_v10  ;;  %v2066_v10 = vrot.slane %v1911_v31, %v1992_v55 }
  0x5d   :  { %936 = vperm.xlu1 %1709, %v1857_v2  }
  0x5e   :  { %1720 = vset.pattern.permute.xlu0 %v1812_v15  ;;  %3506 = vst [vmem:[#allocation26_spill] sm:$0xff] %v2066_v10 }
  0x5f   :  { %1455 = vperm.xlu0 %1720, %v1861_v3  }
  0x61   :  { %1711 = vset.pattern.permute.xlu1 %v1813_v16  ;;  %v2089_v16 = vrot.slane %v1899_v26, %v2023_v63 }
  0x62   :  { %1022 = vperm.xlu1 %1711, %v1857_v2  }
  0x63   :  { %3512 = vst [vmem:[#allocation32_spill] sm:$0xff] %v2089_v16  ;;  %v88_v16 = vld [vmem:[#allocation6 + $0x38] sm:$0xff] }
  0x64   :  { %v2196_v10 = vunpack.c.h.bf16 %v88_v16 }
  0x66   :  { %1025 = vperm.xlu1 %1711, %v1861_v3  }
  0x6a   :  { %1713 = vset.pattern.permute.xlu1 %v1809_v12  ;;  %v2074_v12 = vrot.slane %v1915_v33, %v1992_v55 }
  0x6b   :  { %1111 = vperm.xlu1 %1713, %v1861_v3  }
  0x6c   :  { %3508 = vst [vmem:[#allocation28_spill] sm:$0xff] %v2074_v12  ;;  %v2188_v12 = vunpack.c.h.bf16 %v86_v23 }
  0x6e   :  { %3539 = vst [vmem:[#allocation59_spill] sm:$0xff] %v2188_v12 }
  0x6f   :  { %1714 = vset.pattern.permute.xlu1 %v1810_v13  ;;  %v2078_v13 = vrot.slane %v1917_v34, %v1992_v55 }
  0x70   :  { %1194 = vperm.xlu1 %1714, %v1857_v2  }
  0x71   :  { %3509 = vst [vmem:[#allocation29_spill] sm:$0xff] %v2078_v13  ;;  %v2186_v13 = vunpack.c.l.bf16 %v86_v23 }
  0x73   :  { %3538 = vst [vmem:[#allocation58_spill] sm:$0xff] %v2186_v13 }
  0x74   :  { %1716 = vset.pattern.permute.xlu1 %v1814_v17  ;;  %v2093_v17 = vrot.slane %v1907_v29, %v2023_v63 }
  0x75   :  { %1280 = vperm.xlu1 %1716, %v1857_v2  }
  0x76   :  { %3513 = vst [vmem:[#allocation33_spill] sm:$0xff] %v2093_v17  ;;  %v2117_v17 = vrot.slane %v1897_v25, %v2054_v7 }
  0x78   :  { %3519 = vst [vmem:[#allocation39_spill] sm:$0xff] %v2117_v17  ;;  %v2141_v17 = vrot.slane %v1915_v33, %v2054_v7 }
  0x79   :  { %1283 = vperm.xlu1 %1716, %v1861_v3  }
  0x7a   :  { %3525 = vst [vmem:[#allocation45_spill] sm:$0xff] %v2141_v17 }
  0x7d   :  { %1718 = vset.pattern.permute.xlu1 %v1811_v14  ;;  %v2082_v14 = vrot.slane %v1897_v25, %v2023_v63  ;;  %v2133_v63 = vrot.slane %v1911_v31, %v2054_v7  ;;  %v2164_v7 = vsub.s32 7, %v1893_v19 }
  0x7e   :  { %1369 = vperm.xlu1 %1718, %v1861_v3   ;;  %v2039_v3 = vrot.slane %v1915_v33, %v1961_v47 }
  0x7f   :  { %3510 = vst [vmem:[#allocation30_spill] sm:$0xff] %v2082_v14  ;;  %3523 = vst [vmem:[#allocation43_spill] sm:$0xff] %v2133_v63  ;;  %v2184_v14 = vunpack.c.h.bf16 %v85_v22  ;;  %v2208_v23 = vrot.slane %v1907_v29, %v2164_v7 }
  0x80   :  { %3531 = vst [vmem:[#allocation51_spill] sm:$0xff] %v2164_v7 }
  0x81   :  { %3537 = vst [vmem:[#allocation57_spill] sm:$0xff] %v2184_v14  ;;  %3545 = vst [vmem:[#allocation65_spill] sm:$0xff] %v2208_v23  ;;  %v2388_v23 = vrot.slane %v2192_v11, %v1992_v55 }
  0x82   :  { %1719 = vset.pattern.permute.xlu1 %v1812_v15  ;;  %v2085_v15 = vsub.s32 6, %v1893_v19  ;;  %v2182_v19 = vunpack.c.l.bf16 %v85_v22  ;;  %v2204_v22 = vrot.slane %v1899_v26, %v2164_v7 }
  0x83   :  { %1452 = vperm.xlu1 %1719, %v1857_v2   ;;  %v2035_v2 = vrot.slane %v1913_v32, %v1961_v47  ;;  %3580 = vst [vmem:[#allocation100_spill] sm:$0xff] %v2388_v23 }
  0x84   :  { %3511 = vst [vmem:[#allocation31_spill] sm:$0xff] %v2085_v15  ;;  %v2149_v21 = vrot.slane %v1897_v25, %v2085_v15  ;;  %v2153_v63 = vrot.slane %v1899_v26, %v2085_v15  ;;  %v2157_v24 = vrot.slane %v1907_v29, %v2085_v15  ;;  %v2161_v17 = vrot.slane %v1909_v30, %v2085_v15 }
  0x85   :  { %3536 = vst [vmem:[#allocation56_spill] sm:$0xff] %v2182_v19  ;;  %3544 = vst [vmem:[#allocation64_spill] sm:$0xff] %v2204_v22  ;;  %v2224_v26 = vrot.slane %v1915_v33, %v2164_v7  ;;  %v2228_v29 = vrot.slane %v1917_v34, %v2164_v7 }
  0x86   :  { %3527 = vst [vmem:[#allocation47_spill] sm:$0xff] %v2149_v21  ;;  %3528 = vst [vmem:[#allocation48_spill] sm:$0xff] %v2153_v63  ;;  %v2168_v21 = vrot.slane %v1911_v31, %v2085_v15  ;;  %v2172_v63 = vrot.slane %v1913_v32, %v2085_v15 }
  0x87   :  { %3529 = vst [vmem:[#allocation49_spill] sm:$0xff] %v2157_v24  ;;  %3530 = vst [vmem:[#allocation50_spill] sm:$0xff] %v2161_v17  ;;  %v2176_v24 = vrot.slane %v1915_v33, %v2085_v15  ;;  %v2180_v17 = vrot.slane %v1917_v34, %v2085_v15  ;;  %v2200_v15 = vrot.slane %v1897_v25, %v2164_v7 }
  0x88   :  { %3532 = vst [vmem:[#allocation52_spill] sm:$0xff] %v2168_v21  ;;  %3533 = vst [vmem:[#allocation53_spill] sm:$0xff] %v2172_v63  ;;  %v2190_v21 = vunpack.c.l.bf16 %v87_v18  ;;  %v2194_v63 = vunpack.c.l.bf16 %v88_v16  ;;  %v2212_v18 = vrot.slane %v1909_v30, %v2164_v7  ;;  %v2216_v16 = vrot.slane %v1911_v31, %v2164_v7 }
  0x89   :  { %3534 = vst [vmem:[#allocation54_spill] sm:$0xff] %v2176_v24  ;;  %3535 = vst [vmem:[#allocation55_spill] sm:$0xff] %v2180_v17  ;;  %v2220_v25 = vrot.slane %v1913_v32, %v2164_v7  ;;  %v2232_v30 = vrot.slane %v2182_v19, %v1920_v35  ;;  %v2236_v31 = vrot.slane %v2184_v14, %v1920_v35 }
  0x8a   :  { %3540 = vst [vmem:[#allocation60_spill] sm:$0xff] %v2190_v21  ;;  %3542 = vst [vmem:[#allocation62_spill] sm:$0xff] %v2194_v63  ;;  %v2240_v32 = vrot.slane %v2186_v13, %v1920_v35  ;;  %v2244_v33 = vrot.slane %v2188_v12, %v1920_v35  ;;  %v2248_v7 = vrot.slane %v2190_v21, %v1920_v35 }
  0x8b   :  { %3543 = vst [vmem:[#allocation63_spill] sm:$0xff] %v2200_v15  ;;  %3546 = vst [vmem:[#allocation66_spill] sm:$0xff] %v2212_v18  ;;  %v2252_v34 = vrot.slane %v2192_v11, %v1920_v35  ;;  %v2392_v22 = vrot.slane %v2194_v63, %v1992_v55  ;;  %v2396_v15 = vrot.slane %v2196_v10, %v1992_v55 }
  0x8c   :  { %3547 = vst [vmem:[#allocation67_spill] sm:$0xff] %v2216_v16  ;;  %3548 = vst [vmem:[#allocation68_spill] sm:$0xff] %v2220_v25 }
  0x8d   :  { %3549 = vst [vmem:[#allocation69_spill] sm:$0xff] %v2224_v26  ;;  %3550 = vst [vmem:[#allocation70_spill] sm:$0xff] %v2228_v29 }
  0x8e   :  { %3551 = vst [vmem:[#allocation71_spill] sm:$0xff] %v2232_v30  ;;  %3552 = vst [vmem:[#allocation72_spill] sm:$0xff] %v2236_v31  ;;  %v2256_v30 = vrot.slane %v2194_v63, %v1920_v35  ;;  %v2260_v31 = vrot.slane %v2196_v10, %v1920_v35  ;;  %v2280_v35 = vrot.slane %v2190_v21, %v1902_v27 }
  0x8f   :  { %3553 = vst [vmem:[#allocation73_spill] sm:$0xff] %v2240_v32  ;;  %3554 = vst [vmem:[#allocation74_spill] sm:$0xff] %v2244_v33  ;;  %v2264_v32 = vrot.slane %v2182_v19, %v1902_v27  ;;  %v2268_v33 = vrot.slane %v2184_v14, %v1902_v27 }
  0x90   :  { %3555 = vst [vmem:[#allocation75_spill] sm:$0xff] %v2248_v7  ;;  %3556 = vst [vmem:[#allocation76_spill] sm:$0xff] %v2252_v34  ;;  %v2272_v7 = vrot.slane %v2186_v13, %v1902_v27  ;;  %v2276_v34 = vrot.slane %v2188_v12, %v1902_v27 }
  0x91   :  { %3557 = vst [vmem:[#allocation77_spill] sm:$0xff] %v2256_v30  ;;  %3558 = vst [vmem:[#allocation78_spill] sm:$0xff] %v2260_v31  ;;  %v2300_v31 = vrot.slane %v2184_v14, %v1961_v47 }
  0x92   :  { %3559 = vst [vmem:[#allocation79_spill] sm:$0xff] %v2264_v32  ;;  %3560 = vst [vmem:[#allocation80_spill] sm:$0xff] %v2268_v33  ;;  %v2284_v32 = vrot.slane %v2192_v11, %v1902_v27  ;;  %v2288_v33 = vrot.slane %v2194_v63, %v1902_v27 }
  0x93   :  { %3561 = vst [vmem:[#allocation81_spill] sm:$0xff] %v2272_v7  ;;  %3562 = vst [vmem:[#allocation82_spill] sm:$0xff] %v2276_v34  ;;  %v2292_v7 = vrot.slane %v2196_v10, %v1902_v27  ;;  %v2296_v34 = vrot.slane %v2182_v19, %v1961_v47  ;;  %v2312_v27 = vrot.slane %v2190_v21, %v1961_v47 }
  0x94   :  { %3563 = vst [vmem:[#allocation83_spill] sm:$0xff] %v2280_v35  ;;  %3564 = vst [vmem:[#allocation84_spill] sm:$0xff] %v2284_v32  ;;  %v2304_v35 = vrot.slane %v2186_v13, %v1961_v47  ;;  %v2308_v32 = vrot.slane %v2188_v12, %v1961_v47 }
  0x95   :  { %3565 = vst [vmem:[#allocation85_spill] sm:$0xff] %v2288_v33  ;;  %3566 = vst [vmem:[#allocation86_spill] sm:$0xff] %v2292_v7  ;;  %v2316_v7 = vrot.slane %v2192_v11, %v1961_v47 }
  0x96   :  { %3567 = vst [vmem:[#allocation87_spill] sm:$0xff] %v2296_v34  ;;  %3568 = vst [vmem:[#allocation88_spill] sm:$0xff] %v2300_v31  ;;  %v2320_v34 = vrot.slane %v2194_v63, %v1961_v47  ;;  %v2324_v31 = vrot.slane %v2196_v10, %v1961_v47  ;;  %v2340_v47 = vrot.slane %v2186_v13, %v1992_v55 }
  0x97   :  { %3569 = vst [vmem:[#allocation89_spill] sm:$0xff] %v2304_v35  ;;  %3570 = vst [vmem:[#allocation90_spill] sm:$0xff] %v2308_v32 }
  0x98   :  { %3571 = vst [vmem:[#allocation91_spill] sm:$0xff] %v2312_v27  ;;  %3572 = vst [vmem:[#allocation92_spill] sm:$0xff] %v2316_v7  ;;  %v2332_v7 = vrot.slane %v2182_v19, %v1992_v55 }
  0x99   :  { %3573 = vst [vmem:[#allocation93_spill] sm:$0xff] %v2320_v34  ;;  %3574 = vst [vmem:[#allocation94_spill] sm:$0xff] %v2324_v31  ;;  %v2336_v34 = vrot.slane %v2184_v14, %v1992_v55  ;;  %v2344_v31 = vrot.slane %v2188_v12, %v1992_v55 }
  0x9a   :  { %3575 = vst [vmem:[#allocation95_spill] sm:$0xff] %v2332_v7  ;;  %3577 = vst [vmem:[#allocation97_spill] sm:$0xff] %v2340_v47 }
  0x9b   :  { %3576 = vst [vmem:[#allocation96_spill] sm:$0xff] %v2336_v34  ;;  %3578 = vst [vmem:[#allocation98_spill] sm:$0xff] %v2344_v31 }
  0x9c   :  { %3581 = vst [vmem:[#allocation101_spill] sm:$0xff] %v2392_v22 }
  0xa8   :  { %v249_v30 = vpop.permute.xlu1 %248  ;;  %v163_v27 = vpop.permute.xlu0 %162 }
  0xa9   :  { %vm253_vm0 = vcmp.lt.s32.totalorder %v1895_v20, %v249_v30  ;;  %vm254_vm1 = vcmp.lt.s32.totalorder %v1905_v28, %v249_v30  ;;  %vm255_vm2 = vcmp.lt.s32.totalorder %v1923_v36, %v249_v30  ;;  %vm256_vm3 = vcmp.lt.s32.totalorder %v1926_v37, %v249_v30 }
  0xaa   :  { %vm257_vm4 = vcmp.lt.s32.totalorder %v1929_v38, %v249_v30  ;;  %vm258_vm5 = vcmp.lt.s32.totalorder %v1932_v39, %v249_v30  ;;  %vm259_vm6 = vcmp.lt.s32.totalorder %v1935_v40, %v249_v30  ;;  %vm260_vm7 = vcmp.lt.s32.totalorder %v1938_v41, %v249_v30 }
  0xab   :  { %v301_v19 = vsel %vm253_vm0, %v1942_v42, 0.0  ;;  %v302_v14 = vsel %vm254_vm1, %v1946_v43, 0.0  ;;  %v303_v34 = vsel %vm255_vm2, %v1950_v44, 0.0  ;;  %v304_v13 = vsel %vm256_vm3, %v1954_v45, 0.0 }
  0xac   :  { %vm167_vm8 = vcmp.lt.s32.totalorder %v1895_v20, %v163_v27  ;;  %vm168_vm9 = vcmp.lt.s32.totalorder %v1905_v28, %v163_v27  ;;  %vm169_vm10 = vcmp.lt.s32.totalorder %v1923_v36, %v163_v27  ;;  %vm170_vm11 = vcmp.lt.s32.totalorder %v1926_v37, %v163_v27  ;;  %v252_v18 = vpop.permute.xlu1 %251  ;;  %v166_v22 = vpop.permute.xlu0 %165 }
  0xad   :  { %vm171_vm12 = vcmp.lt.s32.totalorder %v1929_v38, %v163_v27  ;;  %vm172_vm13 = vcmp.lt.s32.totalorder %v1932_v39, %v163_v27  ;;  %vm173_vm14 = vcmp.lt.s32.totalorder %v1935_v40, %v163_v27  ;;  %vm174_vm15 = vcmp.lt.s32.totalorder %v1938_v41, %v163_v27 }
  0xae   :  { %v305_v12 = vsel %vm257_vm4, %v1958_v46, 0.0  ;;  %v306_v31 = vsel %vm258_vm5, %v1965_v48, 0.0  ;;  %v307_v47 = vsel %vm259_vm6, %v1969_v49, 0.0  ;;  %v308_v7 = vsel %vm260_vm7, %v1973_v50, 0.0 }
  0xaf   :  { %v215_v32 = vsel %vm167_vm8, %v1977_v51, 0.0  ;;  %v216_v27 = vsel %vm168_vm9, %v1981_v52, 0.0  ;;  %v217_v35 = vsel %vm169_vm10, %v1985_v53, 0.0  ;;  %v218_v33 = vsel %vm170_vm11, %v1989_v54, 0.0 }
  0xb0   :  { %v219_v29 = vsel %vm171_vm12, %v1996_v56, 0.0  ;;  %v220_v26 = vsel %vm172_vm13, %v2000_v57, 0.0  ;;  %v221_v25 = vsel %vm173_vm14, %v2004_v58, 0.0  ;;  %v222_v16 = vsel %vm174_vm15, %v2008_v59, 0.0 }
  0xb1   :  { %v2384_v30 = vrot.slane %v2190_v21, %v1992_v55  ;;  %v2398_v17 = vadd.f32 %v301_v19, %v215_v32  ;;  %v2400_v24 = vadd.f32 %v302_v14, %v216_v27  ;;  %v2402_v9 = vadd.f32 %v303_v34, %v217_v35 }
  0xb2   :  { %v2404_v21 = vadd.f32 %v304_v13, %v218_v33  ;;  %v2408_v11 = vadd.f32 %v306_v31, %v220_v26  ;;  %v2410_v23 = vadd.f32 %v307_v47, %v221_v25  ;;  %v2412_v63 = vadd.f32 %v308_v7, %v222_v16 }
  0xb3   :  { %3579 = vst [vmem:[#allocation99_spill] sm:$0xff] %v2384_v30  ;;  %v2406_v30 = vadd.f32 %v305_v12, %v219_v29  ;;  %vm261_vm0 = vcmp.lt.s32.totalorder %v1895_v20, %v252_v18  ;;  %vm262_vm1 = vcmp.lt.s32.totalorder %v1905_v28, %v252_v18  ;;  %vm263_vm2 = vcmp.lt.s32.totalorder %v1923_v36, %v252_v18 }
  0xb4   :  { %vm264_vm3 = vcmp.lt.s32.totalorder %v1926_v37, %v252_v18  ;;  %vm265_vm4 = vcmp.lt.s32.totalorder %v1929_v38, %v252_v18  ;;  %vm266_vm5 = vcmp.lt.s32.totalorder %v1932_v39, %v252_v18  ;;  %vm267_vm6 = vcmp.lt.s32.totalorder %v1935_v40, %v252_v18 }
  0xb5   :  { %vm268_vm7 = vcmp.lt.s32.totalorder %v1938_v41, %v252_v18  ;;  %vm175_vm8 = vcmp.lt.s32.totalorder %v1895_v20, %v166_v22  ;;  %vm176_vm9 = vcmp.lt.s32.totalorder %v1905_v28, %v166_v22  ;;  %vm177_vm10 = vcmp.lt.s32.totalorder %v1923_v36, %v166_v22 }
  0xb6   :  { %vm178_vm11 = vcmp.lt.s32.totalorder %v1926_v37, %v166_v22  ;;  %v309_v25 = vsel %vm261_vm0, %v1942_v42, 0.0  ;;  %v310_v26 = vsel %vm262_vm1, %v1946_v43, 0.0  ;;  %v311_v29 = vsel %vm263_vm2, %v1950_v44, 0.0 }
  0xb7   :  { %v312_v31 = vsel %vm264_vm3, %v1954_v45, 0.0  ;;  %vm179_vm12 = vcmp.lt.s32.totalorder %v1929_v38, %v166_v22  ;;  %vm180_vm13 = vcmp.lt.s32.totalorder %v1932_v39, %v166_v22  ;;  %vm181_vm14 = vcmp.lt.s32.totalorder %v1935_v40, %v166_v22 }
  0xb8   :  { %vm182_vm15 = vcmp.lt.s32.totalorder %v1938_v41, %v166_v22  ;;  %v223_v32 = vsel %vm175_vm8, %v1977_v51, 0.0  ;;  %v224_v33 = vsel %vm176_vm9, %v1981_v52, 0.0  ;;  %v225_v34 = vsel %vm177_vm10, %v1985_v53, 0.0  ;;  %v338_v52 = vpop.permute.xlu1 %337 }
  0xb9   :  { %v226_v42 = vsel %vm178_vm11, %v1989_v54, 0.0  ;;  %v313_v43 = vsel %vm265_vm4, %v1958_v46, 0.0  ;;  %v314_v44 = vsel %vm266_vm5, %v1965_v48, 0.0  ;;  %v315_v45 = vsel %vm267_vm6, %v1969_v49, 0.0 }
  0xba   :  { %v316_v51 = vsel %vm268_vm7, %v1973_v50, 0.0  ;;  %v227_v53 = vsel %vm179_vm12, %v1996_v56, 0.0  ;;  %v228_v54 = vsel %vm180_vm13, %v2000_v57, 0.0  ;;  %v229_v55 = vsel %vm181_vm14, %v2004_v58, 0.0  ;;  %v335_v58 = vpop.permute.xlu0 %334 }
  0xbb   :  { %v230_v46 = vsel %vm182_vm15, %v2008_v59, 0.0  ;;  %v325_v7 = vadd.f32 %v309_v25, %v223_v32  ;;  %v326_v12 = vadd.f32 %v310_v26, %v224_v33  ;;  %v327_v48 = vadd.f32 %v311_v29, %v225_v34 }
  0xbc   :  { %v328_v13 = vadd.f32 %v312_v31, %v226_v42  ;;  %vm347_vm0 = vcmp.lt.s32.totalorder %v1895_v20, %v338_v52  ;;  %vm348_vm1 = vcmp.lt.s32.totalorder %v1905_v28, %v338_v52  ;;  %vm349_vm2 = vcmp.lt.s32.totalorder %v1923_v36, %v338_v52 }
  0xbd   :  { %vm350_vm3 = vcmp.lt.s32.totalorder %v1926_v37, %v338_v52  ;;  %vm351_vm4 = vcmp.lt.s32.totalorder %v1929_v38, %v338_v52  ;;  %vm352_vm5 = vcmp.lt.s32.totalorder %v1932_v39, %v338_v52  ;;  %vm353_vm6 = vcmp.lt.s32.totalorder %v1935_v40, %v338_v52 }
  0xbe   :  { %vm354_vm7 = vcmp.lt.s32.totalorder %v1938_v41, %v338_v52  ;;  %v329_v49 = vadd.f32 %v313_v43, %v227_v53  ;;  %v330_v50 = vadd.f32 %v314_v44, %v228_v54  ;;  %v331_v56 = vadd.f32 %v315_v45, %v229_v55 }
  0xbf   :  { %v332_v57 = vadd.f32 %v316_v51, %v230_v46  ;;  %v395_v59 = vsel %vm347_vm0, %v2012_v60, 0.0  ;;  %v396_v14 = vsel %vm348_vm1, %v2016_v61, 0.0  ;;  %v397_v19 = vsel %vm349_vm2, %v2020_v62, 0.0  ;;  %v421_v51 = vpop.permute.xlu1 %420  ;;  %v3582_v46 = vld [vmem:[#allocation25_spill] sm:$0xff] }
  0xc0   :  { %v398_v22 = vsel %vm350_vm3, %v2027_v0, 0.0  ;;  %v399_v18 = vsel %vm351_vm4, %v2031_v1, 0.0  ;;  %v400_v16 = vsel %vm352_vm5, %v2035_v2, 0.0  ;;  %v401_v35 = vsel %vm353_vm6, %v2039_v3, 0.0 }
  0xc1   :  { %v402_v47 = vsel %vm354_vm7, %v2043_v4, 0.0  ;;  %vm339_vm8 = vcmp.lt.s32.totalorder %v1895_v20, %v335_v58  ;;  %vm340_vm9 = vcmp.lt.s32.totalorder %v1905_v28, %v335_v58  ;;  %vm341_vm10 = vcmp.lt.s32.totalorder %v1923_v36, %v335_v58 }
  0xc2   :  { %vm342_vm11 = vcmp.lt.s32.totalorder %v1926_v37, %v335_v58  ;;  %v2474_v27 = vadd.f32 %v395_v59, %v325_v7  ;;  %v2476_v25 = vadd.f32 %v396_v14, %v326_v12  ;;  %v2478_v26 = vadd.f32 %v397_v19, %v327_v48  ;;  %v3583_v12 = vld [vmem:[#allocation26_spill] sm:$0xff] }
  0xc3   :  { %v2480_v29 = vadd.f32 %v398_v22, %v328_v13  ;;  %vm343_vm12 = vcmp.lt.s32.totalorder %v1929_v38, %v335_v58  ;;  %vm344_vm13 = vcmp.lt.s32.totalorder %v1932_v39, %v335_v58  ;;  %vm345_vm14 = vcmp.lt.s32.totalorder %v1935_v40, %v335_v58  ;;  %v3584_v13 = vld [vmem:[#allocation27_spill] sm:$0xff] }
  0xc4   :  { %vm346_vm15 = vcmp.lt.s32.totalorder %v1938_v41, %v335_v58  ;;  %v387_v31 = vsel %vm339_vm8, %v2012_v60, 0.0  ;;  %v388_v32 = vsel %vm340_vm9, %v2016_v61, 0.0  ;;  %v389_v33 = vsel %vm341_vm10, %v2020_v62, 0.0 }
  0xc5   :  { %v390_v34 = vsel %vm342_vm11, %v2027_v0, 0.0  ;;  %v2490_v42 = vadd.f32 %v399_v18, %v329_v49  ;;  %v2492_v43 = vadd.f32 %v400_v16, %v330_v50  ;;  %v2494_v44 = vadd.f32 %v401_v35, %v331_v56 }
  0xc6   :  { %v2496_v45 = vadd.f32 %v402_v47, %v332_v57  ;;  %v391_v52 = vsel %vm343_vm12, %v2031_v1, 0.0  ;;  %v392_v53 = vsel %vm344_vm13, %v2035_v2, 0.0  ;;  %v393_v60 = vsel %vm345_vm14, %v2039_v3, 0.0 }
  0xc7   :  { %v394_v61 = vsel %vm346_vm15, %v2043_v4, 0.0  ;;  %v403_v62 = vadd.f32 %v387_v31, %v2398_v17  ;;  %v404_v0 = vadd.f32 %v388_v32, %v2400_v24  ;;  %v405_v54 = vadd.f32 %v389_v33, %v2402_v9  ;;  %v424_v9 = vpop.permute.xlu0 %423  ;;  %v507_v31 = vpop.permute.xlu1 %506 }
  0xc8   :  { %v406_v55 = vadd.f32 %v390_v34, %v2404_v21  ;;  %vm425_vm0 = vcmp.lt.s32.totalorder %v1895_v20, %v421_v51  ;;  %vm426_vm1 = vcmp.lt.s32.totalorder %v1905_v28, %v421_v51  ;;  %vm427_vm2 = vcmp.lt.s32.totalorder %v1923_v36, %v421_v51 }
  0xc9   :  { %vm428_vm3 = vcmp.lt.s32.totalorder %v1926_v37, %v421_v51  ;;  %vm429_vm4 = vcmp.lt.s32.totalorder %v1929_v38, %v421_v51  ;;  %vm430_vm5 = vcmp.lt.s32.totalorder %v1932_v39, %v421_v51  ;;  %vm431_vm6 = vcmp.lt.s32.totalorder %v1935_v40, %v421_v51 }
  0xca   :  { %vm432_vm7 = vcmp.lt.s32.totalorder %v1938_v41, %v421_v51  ;;  %v407_v1 = vadd.f32 %v391_v52, %v2406_v30  ;;  %v408_v2 = vadd.f32 %v392_v53, %v2408_v11  ;;  %v409_v3 = vadd.f32 %v393_v60, %v2410_v23  ;;  %v3585_v30 = vld [vmem:[#allocation28_spill] sm:$0xff]  ;;  %v3586_v11 = vld [vmem:[#allocation29_spill] sm:$0xff]  ;;  %v3587_v60 = vld [vmem:[#allocation30_spill] sm:$0xff] }
  0xcb   :  { %v410_v4 = vadd.f32 %v394_v61, %v2412_v63  ;;  %v473_v17 = vsel %vm425_vm0, %v2047_v5, 0.0  ;;  %v474_v21 = vsel %vm426_vm1, %v2051_v6, 0.0  ;;  %v475_v24 = vsel %vm427_vm2, %v2058_v8, 0.0  ;;  %v593_v53 = vpop.permute.xlu0 %592 }
  0xcc   :  { %v476_v7 = vsel %vm428_vm3, %v3582_v46, 0.0  ;;  %v477_v48 = vsel %vm429_vm4, %v3583_v12, 0.0  ;;  %v478_v49 = vsel %vm430_vm5, %v3584_v13, 0.0  ;;  %v479_v50 = vsel %vm431_vm6, %v3585_v30, 0.0 }
  0xcd   :  { %v480_v56 = vsel %vm432_vm7, %v3586_v11, 0.0  ;;  %vm433_vm8 = vcmp.lt.s32.totalorder %v1895_v20, %v424_v9  ;;  %vm434_vm9 = vcmp.lt.s32.totalorder %v1905_v28, %v424_v9  ;;  %vm435_vm10 = vcmp.lt.s32.totalorder %v1923_v36, %v424_v9 }
  0xce   :  { %vm436_vm11 = vcmp.lt.s32.totalorder %v1926_v37, %v424_v9  ;;  %v489_v63 = vadd.f32 %v473_v17, %v403_v62  ;;  %v490_v23 = vadd.f32 %v474_v21, %v404_v0  ;;  %v491_v57 = vadd.f32 %v475_v24, %v405_v54  ;;  %v3588_v62 = vld [vmem:[#allocation32_spill] sm:$0xff]  ;;  %v3589_v54 = vld [vmem:[#allocation33_spill] sm:$0xff] }
  0xcf   :  { %v492_v58 = vadd.f32 %v476_v7, %v406_v55  ;;  %vm437_vm12 = vcmp.lt.s32.totalorder %v1929_v38, %v424_v9  ;;  %vm438_vm13 = vcmp.lt.s32.totalorder %v1932_v39, %v424_v9  ;;  %vm439_vm14 = vcmp.lt.s32.totalorder %v1935_v40, %v424_v9 }
  0xd0   :  { %vm440_vm15 = vcmp.lt.s32.totalorder %v1938_v41, %v424_v9  ;;  %v481_v59 = vsel %vm433_vm8, %v2047_v5, 0.0  ;;  %v482_v14 = vsel %vm434_vm9, %v2051_v6, 0.0  ;;  %v483_v19 = vsel %vm435_vm10, %v2058_v8, 0.0  ;;  %v3593_v9 = vld [vmem:[#allocation37_spill] sm:$0xff] }
  0xd1   :  { %v484_v22 = vsel %vm436_vm11, %v3582_v46, 0.0  ;;  %v493_v18 = vadd.f32 %v477_v48, %v407_v1  ;;  %v494_v16 = vadd.f32 %v478_v49, %v408_v2  ;;  %v495_v35 = vadd.f32 %v479_v50, %v409_v3  ;;  %v3590_v1 = vld [vmem:[#allocation34_spill] sm:$0xff] }
  0xd2   :  { %v496_v47 = vadd.f32 %v480_v56, %v410_v4  ;;  %v485_v32 = vsel %vm437_vm12, %v3583_v12, 0.0  ;;  %v486_v33 = vsel %vm438_vm13, %v3584_v13, 0.0  ;;  %v487_v34 = vsel %vm439_vm14, %v3585_v30, 0.0  ;;  %v3592_v4 = vld [vmem:[#allocation36_spill] sm:$0xff]  ;;  %v3595_v12 = vld [vmem:[#allocation39_spill] sm:$0xff]  ;;  %v3597_v30 = vld [vmem:[#allocation41_spill] sm:$0xff] }
  0xd3   :  { %v488_v51 = vsel %vm440_vm15, %v3586_v11, 0.0  ;;  %v2543_v5 = vadd.f32 %v481_v59, %v2474_v27  ;;  %v2546_v6 = vadd.f32 %v482_v14, %v2476_v25  ;;  %v2549_v8 = vadd.f32 %v483_v19, %v2478_v26  ;;  %v3596_v13 = vld [vmem:[#allocation40_spill] sm:$0xff]  ;;  %v3598_v11 = vld [vmem:[#allocation42_spill] sm:$0xff]  ;;  %v3599_v14 = vld [vmem:[#allocation43_spill] sm:$0xff] }
  0xd4   :  { %v2552_v52 = vadd.f32 %v484_v22, %v2480_v29  ;;  %vm511_vm0 = vcmp.lt.s32.totalorder %v1895_v20, %v507_v31  ;;  %vm512_vm1 = vcmp.lt.s32.totalorder %v1905_v28, %v507_v31  ;;  %vm513_vm2 = vcmp.lt.s32.totalorder %v1923_v36, %v507_v31  ;;  %v3600_v22 = vld [vmem:[#allocation44_spill] sm:$0xff] }
  0xd5   :  { %vm514_vm3 = vcmp.lt.s32.totalorder %v1926_v37, %v507_v31  ;;  %vm515_vm4 = vcmp.lt.s32.totalorder %v1929_v38, %v507_v31  ;;  %vm516_vm5 = vcmp.lt.s32.totalorder %v1932_v39, %v507_v31  ;;  %vm517_vm6 = vcmp.lt.s32.totalorder %v1935_v40, %v507_v31 }
  0xd6   :  { %vm518_vm7 = vcmp.lt.s32.totalorder %v1938_v41, %v507_v31  ;;  %v2563_v27 = vadd.f32 %v485_v32, %v2490_v42  ;;  %v2566_v25 = vadd.f32 %v486_v33, %v2492_v43  ;;  %v2569_v26 = vadd.f32 %v487_v34, %v2494_v44  ;;  %v3591_v42 = vld [vmem:[#allocation35_spill] sm:$0xff]  ;;  %v3594_v44 = vld [vmem:[#allocation38_spill] sm:$0xff]  ;;  %v3601_v32 = vld [vmem:[#allocation45_spill] sm:$0xff] }
  0xd7   :  { %v2572_v29 = vadd.f32 %v488_v51, %v2496_v45  ;;  %v559_v61 = vsel %vm511_vm0, %v3587_v60, 0.0  ;;  %v560_v0 = vsel %vm512_vm1, %v3588_v62, 0.0  ;;  %v561_v55 = vsel %vm513_vm2, %v3589_v54, 0.0  ;;  %v3602_v34 = vld [vmem:[#allocation46_spill] sm:$0xff] }
  0xd8   :  { %v562_v2 = vsel %vm514_vm3, %v3590_v1, 0.0  ;;  %v563_v3 = vsel %vm515_vm4, %v3591_v42, 0.0  ;;  %v564_v43 = vsel %vm516_vm5, %v3592_v4, 0.0  ;;  %v565_v17 = vsel %vm517_vm6, %v3593_v9, 0.0 }
  0xd9   :  { %v566_v21 = vsel %vm518_vm7, %v3594_v44, 0.0  ;;  %vm597_vm8 = vcmp.lt.s32.totalorder %v1895_v20, %v593_v53  ;;  %vm598_vm9 = vcmp.lt.s32.totalorder %v1905_v28, %v593_v53  ;;  %vm599_vm10 = vcmp.lt.s32.totalorder %v1923_v36, %v593_v53 }
  0xda   :  { %vm600_vm11 = vcmp.lt.s32.totalorder %v1926_v37, %v593_v53  ;;  %v575_v45 = vadd.f32 %v559_v61, %v489_v63  ;;  %v576_v24 = vadd.f32 %v560_v0, %v490_v23  ;;  %v577_v46 = vadd.f32 %v561_v55, %v491_v57  ;;  %v510_v63 = vpop.permute.xlu1 %509 }
  0xdb   :  { %v578_v7 = vadd.f32 %v562_v2, %v492_v58  ;;  %vm601_vm12 = vcmp.lt.s32.totalorder %v1929_v38, %v593_v53  ;;  %vm602_vm13 = vcmp.lt.s32.totalorder %v1932_v39, %v593_v53  ;;  %vm603_vm14 = vcmp.lt.s32.totalorder %v1935_v40, %v593_v53 }
  0xdc   :  { %vm604_vm15 = vcmp.lt.s32.totalorder %v1938_v41, %v593_v53  ;;  %v645_v48 = vsel %vm597_vm8, %v3595_v12, 0.0  ;;  %v646_v49 = vsel %vm598_vm9, %v3596_v13, 0.0  ;;  %v647_v50 = vsel %vm599_vm10, %v3597_v30, 0.0 }
  0xdd   :  { %v648_v56 = vsel %vm600_vm11, %v3598_v11, 0.0  ;;  %v579_v23 = vadd.f32 %v563_v3, %v493_v18  ;;  %v580_v57 = vadd.f32 %v564_v43, %v494_v16  ;;  %v581_v58 = vadd.f32 %v565_v17, %v495_v35 }
  0xde   :  { %v582_v59 = vadd.f32 %v566_v21, %v496_v47  ;;  %v649_v19 = vsel %vm601_vm12, %v3599_v14, 0.0  ;;  %v650_v31 = vsel %vm602_vm13, %v3600_v22, 0.0  ;;  %v651_v33 = vsel %vm603_vm14, %v3601_v32, 0.0  ;;  %v596_v2 = vpop.permute.xlu1 %595 }
  0xdf   :  { %v652_v51 = vsel %vm604_vm15, %v3602_v34, 0.0  ;;  %v2598_v53 = vadd.f32 %v645_v48, %v575_v45  ;;  %v2600_v61 = vadd.f32 %v646_v49, %v576_v24  ;;  %v2602_v0 = vadd.f32 %v647_v50, %v577_v46  ;;  %v682_v48 = vpop.permute.xlu0 %681 }
  0xe0   :  { %v2604_v55 = vadd.f32 %v648_v56, %v578_v7  ;;  %vm519_vm0 = vcmp.lt.s32.totalorder %v1895_v20, %v510_v63  ;;  %vm520_vm1 = vcmp.lt.s32.totalorder %v1905_v28, %v510_v63  ;;  %vm521_vm2 = vcmp.lt.s32.totalorder %v1923_v36, %v510_v63 }
  0xe1   :  { %vm522_vm3 = vcmp.lt.s32.totalorder %v1926_v37, %v510_v63  ;;  %vm523_vm4 = vcmp.lt.s32.totalorder %v1929_v38, %v510_v63  ;;  %vm524_vm5 = vcmp.lt.s32.totalorder %v1932_v39, %v510_v63  ;;  %vm525_vm6 = vcmp.lt.s32.totalorder %v1935_v40, %v510_v63 }
  0xe2   :  { %vm526_vm7 = vcmp.lt.s32.totalorder %v1938_v41, %v510_v63  ;;  %v2614_v18 = vadd.f32 %v649_v19, %v579_v23  ;;  %v2616_v16 = vadd.f32 %v650_v31, %v580_v57  ;;  %v2618_v35 = vadd.f32 %v651_v33, %v581_v58  ;;  %v679_v23 = vpop.permute.xlu1 %678  ;;  %v3603_v57 = vld [vmem:[#allocation47_spill] sm:$0xff]  ;;  %v3605_v19 = vld [vmem:[#allocation49_spill] sm:$0xff]  ;;  %v3606_v31 = vld [vmem:[#allocation50_spill] sm:$0xff] }
  0xe3   :  { %v2620_v47 = vadd.f32 %v652_v51, %v582_v59  ;;  %v567_v3 = vsel %vm519_vm0, %v3587_v60, 0.0  ;;  %v568_v43 = vsel %vm520_vm1, %v3588_v62, 0.0  ;;  %v569_v17 = vsel %vm521_vm2, %v3589_v54, 0.0  ;;  %v3604_v59 = vld [vmem:[#allocation48_spill] sm:$0xff]  ;;  %v3608_v51 = vld [vmem:[#allocation53_spill] sm:$0xff] }
  0xe4   :  { %v570_v21 = vsel %vm522_vm3, %v3590_v1, 0.0  ;;  %v571_v45 = vsel %vm523_vm4, %v3591_v42, 0.0  ;;  %v572_v24 = vsel %vm524_vm5, %v3592_v4, 0.0  ;;  %v573_v46 = vsel %vm525_vm6, %v3593_v9, 0.0  ;;  %v3607_v33 = vld [vmem:[#allocation52_spill] sm:$0xff] }
  0xe5   :  { %v574_v7 = vsel %vm526_vm7, %v3594_v44, 0.0  ;;  %vm605_vm8 = vcmp.lt.s32.totalorder %v1895_v20, %v596_v2  ;;  %vm606_vm9 = vcmp.lt.s32.totalorder %v1905_v28, %v596_v2  ;;  %vm607_vm10 = vcmp.lt.s32.totalorder %v1923_v36, %v596_v2 }
  0xe6   :  { %vm608_vm11 = vcmp.lt.s32.totalorder %v1926_v37, %v596_v2  ;;  %v583_v60 = vadd.f32 %v567_v3, %v2543_v5  ;;  %v584_v62 = vadd.f32 %v568_v43, %v2546_v6  ;;  %v585_v54 = vadd.f32 %v569_v17, %v2549_v8  ;;  %v3609_v3 = vld [vmem:[#allocation54_spill] sm:$0xff]  ;;  %v3610_v17 = vld [vmem:[#allocation55_spill] sm:$0xff] }
  0xe7   :  { %v586_v1 = vadd.f32 %v570_v21, %v2552_v52  ;;  %vm609_vm12 = vcmp.lt.s32.totalorder %v1929_v38, %v596_v2  ;;  %vm610_vm13 = vcmp.lt.s32.totalorder %v1932_v39, %v596_v2  ;;  %vm611_vm14 = vcmp.lt.s32.totalorder %v1935_v40, %v596_v2 }
  0xe8   :  { %vm612_vm15 = vcmp.lt.s32.totalorder %v1938_v41, %v596_v2  ;;  %v653_v42 = vsel %vm605_vm8, %v3595_v12, 0.0  ;;  %v654_v4 = vsel %vm606_vm9, %v3596_v13, 0.0  ;;  %v655_v5 = vsel %vm607_vm10, %v3597_v30, 0.0 }
  0xe9   :  { %v656_v6 = vsel %vm608_vm11, %v3598_v11, 0.0  ;;  %v587_v8 = vadd.f32 %v571_v45, %v2563_v27  ;;  %v588_v52 = vadd.f32 %v572_v24, %v2566_v25  ;;  %v589_v9 = vadd.f32 %v573_v46, %v2569_v26 }
  0xea   :  { %v590_v44 = vadd.f32 %v574_v7, %v2572_v29  ;;  %v657_v49 = vsel %vm609_vm12, %v3599_v14, 0.0  ;;  %v658_v50 = vsel %vm610_vm13, %v3600_v22, 0.0  ;;  %v659_v12 = vsel %vm611_vm14, %v3601_v32, 0.0 }
  0xeb   :  { %v660_v13 = vsel %vm612_vm15, %v3602_v34, 0.0  ;;  %v669_v30 = vadd.f32 %v653_v42, %v583_v60  ;;  %v670_v56 = vadd.f32 %v654_v4, %v584_v62  ;;  %v671_v11 = vadd.f32 %v655_v5, %v585_v54 }
  0xec   :  { %v672_v63 = vadd.f32 %v656_v6, %v586_v1  ;;  %vm691_vm0 = vcmp.lt.s32.totalorder %v1895_v20, %v682_v48  ;;  %vm692_vm1 = vcmp.lt.s32.totalorder %v1905_v28, %v682_v48  ;;  %vm693_vm2 = vcmp.lt.s32.totalorder %v1923_v36, %v682_v48 }
  0xed   :  { %vm694_vm3 = vcmp.lt.s32.totalorder %v1926_v37, %v682_v48  ;;  %vm695_vm4 = vcmp.lt.s32.totalorder %v1929_v38, %v682_v48  ;;  %vm696_vm5 = vcmp.lt.s32.totalorder %v1932_v39, %v682_v48  ;;  %vm697_vm6 = vcmp.lt.s32.totalorder %v1935_v40, %v682_v48 }
  0xee   :  { %vm698_vm7 = vcmp.lt.s32.totalorder %v1938_v41, %v682_v48  ;;  %v673_v27 = vadd.f32 %v657_v49, %v587_v8  ;;  %v674_v25 = vadd.f32 %v658_v50, %v588_v52  ;;  %v675_v26 = vadd.f32 %v659_v12, %v589_v9  ;;  %v765_v8 = vpop.permute.xlu1 %764 }
  0xef   :  { %v676_v29 = vadd.f32 %v660_v13, %v590_v44  ;;  %v739_v58 = vsel %vm691_vm0, %v3603_v57, 0.0  ;;  %v740_v14 = vsel %vm692_vm1, %v3604_v59, 0.0  ;;  %v741_v22 = vsel %vm693_vm2, %v3605_v19, 0.0 }
  0xf0   :  { %v742_v32 = vsel %vm694_vm3, %v3606_v31, 0.0  ;;  %v743_v34 = vsel %vm695_vm4, %v3607_v33, 0.0  ;;  %v744_v2 = vsel %vm696_vm5, %v3608_v51, 0.0  ;;  %v745_v43 = vsel %vm697_vm6, %v3609_v3, 0.0 }
  0xf1   :  { %v746_v21 = vsel %vm698_vm7, %v3610_v17, 0.0  ;;  %vm683_vm8 = vcmp.lt.s32.totalorder %v1895_v20, %v679_v23  ;;  %vm684_vm9 = vcmp.lt.s32.totalorder %v1905_v28, %v679_v23  ;;  %vm685_vm10 = vcmp.lt.s32.totalorder %v1923_v36, %v679_v23 }
  0xf2   :  { %vm686_vm11 = vcmp.lt.s32.totalorder %v1926_v37, %v679_v23  ;;  %v2674_v45 = vadd.f32 %v739_v58, %v669_v30  ;;  %v2676_v24 = vadd.f32 %v740_v14, %v670_v56  ;;  %v2678_v46 = vadd.f32 %v741_v22, %v671_v11  ;;  %v851_v30 = vpop.permute.xlu0 %850  ;;  %v3611_v56 = vld [vmem:[#allocation63_spill] sm:$0xff] }
  0xf3   :  { %v2680_v7 = vadd.f32 %v742_v32, %v672_v63  ;;  %vm687_vm12 = vcmp.lt.s32.totalorder %v1929_v38, %v679_v23  ;;  %vm688_vm13 = vcmp.lt.s32.totalorder %v1932_v39, %v679_v23  ;;  %vm689_vm14 = vcmp.lt.s32.totalorder %v1935_v40, %v679_v23  ;;  %v3612_v63 = vld [vmem:[#allocation64_spill] sm:$0xff] }
  0xf4   :  { %vm690_vm15 = vcmp.lt.s32.totalorder %v1938_v41, %v679_v23  ;;  %v731_v60 = vsel %vm683_vm8, %v3603_v57, 0.0  ;;  %v732_v62 = vsel %vm684_vm9, %v3604_v59, 0.0  ;;  %v733_v54 = vsel %vm685_vm10, %v3605_v19, 0.0  ;;  %v3615_v57 = vld [vmem:[#allocation67_spill] sm:$0xff]  ;;  %v3616_v59 = vld [vmem:[#allocation68_spill] sm:$0xff] }
  0xf5   :  { %v734_v1 = vsel %vm686_vm11, %v3606_v31, 0.0  ;;  %v2690_v42 = vadd.f32 %v743_v34, %v673_v27  ;;  %v2692_v4 = vadd.f32 %v744_v2, %v674_v25  ;;  %v2694_v5 = vadd.f32 %v745_v43, %v675_v26  ;;  %v3613_v25 = vld [vmem:[#allocation65_spill] sm:$0xff] }
  0xf6   :  { %v2696_v6 = vadd.f32 %v746_v21, %v676_v29  ;;  %v735_v52 = vsel %vm687_vm12, %v3607_v33, 0.0  ;;  %v736_v9 = vsel %vm688_vm13, %v3608_v51, 0.0  ;;  %v737_v44 = vsel %vm689_vm14, %v3609_v3, 0.0  ;;  %v3614_v29 = vld [vmem:[#allocation66_spill] sm:$0xff]  ;;  %v3619_v33 = vld [vmem:[#allocation71_spill] sm:$0xff]  ;;  %v3620_v51 = vld [vmem:[#allocation72_spill] sm:$0xff] }
  0xf7   :  { %v738_v48 = vsel %vm690_vm15, %v3610_v17, 0.0  ;;  %v747_v49 = vadd.f32 %v731_v60, %v2598_v53  ;;  %v748_v50 = vadd.f32 %v732_v62, %v2600_v61  ;;  %v749_v12 = vadd.f32 %v733_v54, %v2602_v0  ;;  %v3621_v3 = vld [vmem:[#allocation73_spill] sm:$0xff]  ;;  %v3622_v17 = vld [vmem:[#allocation74_spill] sm:$0xff]  ;;  %v768_v60 = vpop.permute.xlu1 %767 }
  0xf8   :  { %v750_v13 = vadd.f32 %v734_v1, %v2604_v55  ;;  %vm769_vm0 = vcmp.lt.s32.totalorder %v1895_v20, %v765_v8  ;;  %vm770_vm1 = vcmp.lt.s32.totalorder %v1905_v28, %v765_v8  ;;  %vm771_vm2 = vcmp.lt.s32.totalorder %v1923_v36, %v765_v8 }
  0xf9   :  { %vm772_vm3 = vcmp.lt.s32.totalorder %v1926_v37, %v765_v8  ;;  %vm773_vm4 = vcmp.lt.s32.totalorder %v1929_v38, %v765_v8  ;;  %vm774_vm5 = vcmp.lt.s32.totalorder %v1932_v39, %v765_v8  ;;  %vm775_vm6 = vcmp.lt.s32.totalorder %v1935_v40, %v765_v8 }
  0xfa   :  { %vm776_vm7 = vcmp.lt.s32.totalorder %v1938_v41, %v765_v8  ;;  %v751_v53 = vadd.f32 %v735_v52, %v2614_v18  ;;  %v752_v61 = vadd.f32 %v736_v9, %v2616_v16  ;;  %v753_v0 = vadd.f32 %v737_v44, %v2618_v35  ;;  %v3617_v18 = vld [vmem:[#allocation69_spill] sm:$0xff]  ;;  %v3618_v16 = vld [vmem:[#allocation70_spill] sm:$0xff]  ;;  %v3623_v52 = vld [vmem:[#allocation75_spill] sm:$0xff] }
  0xfb   :  { %v754_v55 = vadd.f32 %v738_v48, %v2620_v47  ;;  %v817_v11 = vsel %vm769_vm0, %v3611_v56, 0.0  ;;  %v818_v27 = vsel %vm770_vm1, %v3612_v63, 0.0  ;;  %v819_v26 = vsel %vm771_vm2, %v3613_v25, 0.0  ;;  %v3624_v44 = vld [vmem:[#allocation76_spill] sm:$0xff] }
  0xfc   :  { %v820_v23 = vsel %vm772_vm3, %v3614_v29, 0.0  ;;  %v821_v58 = vsel %vm773_vm4, %v3615_v57, 0.0  ;;  %v822_v14 = vsel %vm774_vm5, %v3616_v59, 0.0  ;;  %v823_v19 = vsel %vm775_vm6, %v3617_v18, 0.0 }
  0xfd   :  { %v824_v22 = vsel %vm776_vm7, %v3618_v16, 0.0  ;;  %vm855_vm8 = vcmp.lt.s32.totalorder %v1895_v20, %v851_v30  ;;  %vm856_vm9 = vcmp.lt.s32.totalorder %v1905_v28, %v851_v30  ;;  %vm857_vm10 = vcmp.lt.s32.totalorder %v1923_v36, %v851_v30 }
  0xfe   :  { %vm858_vm11 = vcmp.lt.s32.totalorder %v1926_v37, %v851_v30  ;;  %v833_v35 = vadd.f32 %v817_v11, %v747_v49  ;;  %v834_v47 = vadd.f32 %v818_v27, %v748_v50  ;;  %v835_v31 = vadd.f32 %v819_v26, %v749_v12  ;;  %v3625_v49 = vld [vmem:[#allocation77_spill] sm:$0xff]  ;;  %v3626_v12 = vld [vmem:[#allocation78_spill] sm:$0xff] }
  0xff   :  { %v836_v32 = vadd.f32 %v820_v23, %v750_v13  ;;  %vm859_vm12 = vcmp.lt.s32.totalorder %v1929_v38, %v851_v30  ;;  %vm860_vm13 = vcmp.lt.s32.totalorder %v1932_v39, %v851_v30  ;;  %vm861_vm14 = vcmp.lt.s32.totalorder %v1935_v40, %v851_v30  ;;  %v854_v23 = vpop.permute.xlu1 %853 }
 0x100   :  { %vm862_vm15 = vcmp.lt.s32.totalorder %v1938_v41, %v851_v30  ;;  %v903_v34 = vsel %vm855_vm8, %v3619_v33, 0.0  ;;  %v904_v2 = vsel %vm856_vm9, %v3620_v51, 0.0  ;;  %v905_v43 = vsel %vm857_vm10, %v3621_v3, 0.0 }
 0x101   :  { %v906_v21 = vsel %vm858_vm11, %v3622_v17, 0.0  ;;  %v837_v62 = vadd.f32 %v821_v58, %v751_v53  ;;  %v838_v54 = vadd.f32 %v822_v14, %v752_v61  ;;  %v839_v1 = vadd.f32 %v823_v19, %v753_v0 }
 0x102   :  { %v840_v8 = vadd.f32 %v824_v22, %v754_v55  ;;  %v907_v9 = vsel %vm859_vm12, %v3623_v52, 0.0  ;;  %v908_v48 = vsel %vm860_vm13, %v3624_v44, 0.0  ;;  %v909_v50 = vsel %vm861_vm14, %v3625_v49, 0.0 }
 0x103   :  { %v910_v13 = vsel %vm862_vm15, %v3626_v12, 0.0  ;;  %v2742_v30 = vadd.f32 %v903_v34, %v833_v35  ;;  %v2744_v11 = vadd.f32 %v904_v2, %v834_v47  ;;  %v2746_v27 = vadd.f32 %v905_v43, %v835_v31  ;;  %v940_v34 = vpop.permute.xlu0 %939 }
 0x104   :  { %v2748_v26 = vadd.f32 %v906_v21, %v836_v32  ;;  %vm777_vm0 = vcmp.lt.s32.totalorder %v1895_v20, %v768_v60  ;;  %vm778_vm1 = vcmp.lt.s32.totalorder %v1905_v28, %v768_v60  ;;  %vm779_vm2 = vcmp.lt.s32.totalorder %v1923_v36, %v768_v60 }
 0x105   :  { %vm780_vm3 = vcmp.lt.s32.totalorder %v1926_v37, %v768_v60  ;;  %vm781_vm4 = vcmp.lt.s32.totalorder %v1929_v38, %v768_v60  ;;  %vm782_vm5 = vcmp.lt.s32.totalorder %v1932_v39, %v768_v60  ;;  %vm783_vm6 = vcmp.lt.s32.totalorder %v1935_v40, %v768_v60 }
 0x106   :  { %vm784_vm7 = vcmp.lt.s32.totalorder %v1938_v41, %v768_v60  ;;  %v2758_v53 = vadd.f32 %v907_v9, %v837_v62  ;;  %v2760_v61 = vadd.f32 %v908_v48, %v838_v54  ;;  %v2762_v0 = vadd.f32 %v909_v50, %v839_v1  ;;  %v937_v62 = vpop.permute.xlu1 %936  ;;  %v3627_v54 = vld [vmem:[#allocation79_spill] sm:$0xff]  ;;  %v3629_v9 = vld [vmem:[#allocation81_spill] sm:$0xff]  ;;  %v3630_v48 = vld [vmem:[#allocation82_spill] sm:$0xff] }
 0x107   :  { %v2764_v55 = vadd.f32 %v910_v13, %v840_v8  ;;  %v825_v58 = vsel %vm777_vm0, %v3611_v56, 0.0  ;;  %v826_v14 = vsel %vm778_vm1, %v3612_v63, 0.0  ;;  %v827_v19 = vsel %vm779_vm2, %v3613_v25, 0.0  ;;  %v3628_v8 = vld [vmem:[#allocation80_spill] sm:$0xff]  ;;  %v3631_v50 = vld [vmem:[#allocation83_spill] sm:$0xff] }
 0x108   :  { %v828_v22 = vsel %vm780_vm3, %v3614_v29, 0.0  ;;  %v829_v35 = vsel %vm781_vm4, %v3615_v57, 0.0  ;;  %v830_v47 = vsel %vm782_vm5, %v3616_v59, 0.0  ;;  %v831_v31 = vsel %vm783_vm6, %v3617_v18, 0.0  ;;  %v3632_v13 = vld [vmem:[#allocation84_spill] sm:$0xff] }
 0x109   :  { %v832_v32 = vsel %vm784_vm7, %v3618_v16, 0.0  ;;  %vm863_vm8 = vcmp.lt.s32.totalorder %v1895_v20, %v854_v23  ;;  %vm864_vm9 = vcmp.lt.s32.totalorder %v1905_v28, %v854_v23  ;;  %vm865_vm10 = vcmp.lt.s32.totalorder %v1923_v36, %v854_v23 }
 0x10a   :  { %vm866_vm11 = vcmp.lt.s32.totalorder %v1926_v37, %v854_v23  ;;  %v841_v56 = vadd.f32 %v825_v58, %v2674_v45  ;;  %v842_v63 = vadd.f32 %v826_v14, %v2676_v24  ;;  %v843_v25 = vadd.f32 %v827_v19, %v2678_v46  ;;  %v3633_v58 = vld [vmem:[#allocation85_spill] sm:$0xff]  ;;  %v3634_v19 = vld [vmem:[#allocation86_spill] sm:$0xff] }
 0x10b   :  { %v844_v29 = vadd.f32 %v828_v22, %v2680_v7  ;;  %vm867_vm12 = vcmp.lt.s32.totalorder %v1929_v38, %v854_v23  ;;  %vm868_vm13 = vcmp.lt.s32.totalorder %v1932_v39, %v854_v23  ;;  %vm869_vm14 = vcmp.lt.s32.totalorder %v1935_v40, %v854_v23 }
 0x10c   :  { %vm870_vm15 = vcmp.lt.s32.totalorder %v1938_v41, %v854_v23  ;;  %v911_v57 = vsel %vm863_vm8, %v3619_v33, 0.0  ;;  %v912_v59 = vsel %vm864_vm9, %v3620_v51, 0.0  ;;  %v913_v45 = vsel %vm865_vm10, %v3621_v3, 0.0 }
 0x10d   :  { %v914_v24 = vsel %vm866_vm11, %v3622_v17, 0.0  ;;  %v845_v46 = vadd.f32 %v829_v35, %v2690_v42  ;;  %v846_v7 = vadd.f32 %v830_v47, %v2692_v4  ;;  %v847_v18 = vadd.f32 %v831_v31, %v2694_v5 }
 0x10e   :  { %v848_v16 = vadd.f32 %v832_v32, %v2696_v6  ;;  %v915_v2 = vsel %vm867_vm12, %v3623_v52, 0.0  ;;  %v916_v43 = vsel %vm868_vm13, %v3624_v44, 0.0  ;;  %v917_v33 = vsel %vm869_vm14, %v3625_v49, 0.0 }
 0x10f   :  { %v918_v51 = vsel %vm870_vm15, %v3626_v12, 0.0  ;;  %v927_v3 = vadd.f32 %v911_v57, %v841_v56  ;;  %v928_v21 = vadd.f32 %v912_v59, %v842_v63  ;;  %v929_v17 = vadd.f32 %v913_v45, %v843_v25 }
 0x110   :  { %v930_v60 = vadd.f32 %v914_v24, %v844_v29  ;;  %vm949_vm0 = vcmp.lt.s32.totalorder %v1895_v20, %v940_v34  ;;  %vm950_vm1 = vcmp.lt.s32.totalorder %v1905_v28, %v940_v34  ;;  %vm951_vm2 = vcmp.lt.s32.totalorder %v1923_v36, %v940_v34 }
 0x111   :  { %vm952_vm3 = vcmp.lt.s32.totalorder %v1926_v37, %v940_v34  ;;  %vm953_vm4 = vcmp.lt.s32.totalorder %v1929_v38, %v940_v34  ;;  %vm954_vm5 = vcmp.lt.s32.totalorder %v1932_v39, %v940_v34  ;;  %vm955_vm6 = vcmp.lt.s32.totalorder %v1935_v40, %v940_v34 }
 0x112   :  { %vm956_vm7 = vcmp.lt.s32.totalorder %v1938_v41, %v940_v34  ;;  %v931_v42 = vadd.f32 %v915_v2, %v845_v46  ;;  %v932_v4 = vadd.f32 %v916_v43, %v846_v7  ;;  %v933_v5 = vadd.f32 %v917_v33, %v847_v18  ;;  %v1023_v46 = vpop.permute.xlu1 %1022 }
 0x113   :  { %v934_v6 = vadd.f32 %v918_v51, %v848_v16  ;;  %v997_v1 = vsel %vm949_vm0, %v3627_v54, 0.0  ;;  %v998_v52 = vsel %vm950_vm1, %v3628_v8, 0.0  ;;  %v999_v44 = vsel %vm951_vm2, %v3629_v9, 0.0 }
 0x114   :  { %v1000_v49 = vsel %vm952_vm3, %v3630_v48, 0.0  ;;  %v1001_v12 = vsel %vm953_vm4, %v3631_v50, 0.0  ;;  %v1002_v23 = vsel %vm954_vm5, %v3632_v13, 0.0  ;;  %v1003_v14 = vsel %vm955_vm6, %v3633_v58, 0.0 }
 0x115   :  { %v1004_v22 = vsel %vm956_vm7, %v3634_v19, 0.0  ;;  %vm941_vm8 = vcmp.lt.s32.totalorder %v1895_v20, %v937_v62  ;;  %vm942_vm9 = vcmp.lt.s32.totalorder %v1905_v28, %v937_v62  ;;  %vm943_vm10 = vcmp.lt.s32.totalorder %v1923_v36, %v937_v62 }
 0x116   :  { %vm944_vm11 = vcmp.lt.s32.totalorder %v1926_v37, %v937_v62  ;;  %v2818_v35 = vadd.f32 %v997_v1, %v927_v3  ;;  %v2820_v47 = vadd.f32 %v998_v52, %v928_v21  ;;  %v2822_v31 = vadd.f32 %v999_v44, %v929_v17  ;;  %v1109_v3 = vpop.permute.xlu0 %1108  ;;  %v3635_v21 = vld [vmem:[#allocation87_spill] sm:$0xff] }
 0x117   :  { %v2824_v32 = vadd.f32 %v1000_v49, %v930_v60  ;;  %vm945_vm12 = vcmp.lt.s32.totalorder %v1929_v38, %v937_v62  ;;  %vm946_vm13 = vcmp.lt.s32.totalorder %v1932_v39, %v937_v62  ;;  %vm947_vm14 = vcmp.lt.s32.totalorder %v1935_v40, %v937_v62  ;;  %v3636_v60 = vld [vmem:[#allocation88_spill] sm:$0xff] }
 0x118   :  { %vm948_vm15 = vcmp.lt.s32.totalorder %v1938_v41, %v937_v62  ;;  %v989_v56 = vsel %vm941_vm8, %v3627_v54, 0.0  ;;  %v990_v63 = vsel %vm942_vm9, %v3628_v8, 0.0  ;;  %v991_v25 = vsel %vm943_vm10, %v3629_v9, 0.0  ;;  %v3639_v54 = vld [vmem:[#allocation91_spill] sm:$0xff]  ;;  %v3640_v8 = vld [vmem:[#allocation92_spill] sm:$0xff] }
 0x119   :  { %v992_v29 = vsel %vm944_vm11, %v3630_v48, 0.0  ;;  %v2834_v57 = vadd.f32 %v1001_v12, %v931_v42  ;;  %v2836_v59 = vadd.f32 %v1002_v23, %v932_v4  ;;  %v2838_v45 = vadd.f32 %v1003_v14, %v933_v5  ;;  %v3637_v4 = vld [vmem:[#allocation89_spill] sm:$0xff] }
 0x11a   :  { %v2840_v24 = vadd.f32 %v1004_v22, %v934_v6  ;;  %v993_v7 = vsel %vm945_vm12, %v3631_v50, 0.0  ;;  %v994_v18 = vsel %vm946_vm13, %v3632_v13, 0.0  ;;  %v995_v16 = vsel %vm947_vm14, %v3633_v58, 0.0  ;;  %v3638_v6 = vld [vmem:[#allocation90_spill] sm:$0xff]  ;;  %v3643_v50 = vld [vmem:[#allocation95_spill] sm:$0xff]  ;;  %v3644_v13 = vld [vmem:[#allocation96_spill] sm:$0xff] }
 0x11b   :  { %v996_v34 = vsel %vm948_vm15, %v3634_v19, 0.0  ;;  %v1005_v2 = vadd.f32 %v989_v56, %v2742_v30  ;;  %v1006_v43 = vadd.f32 %v990_v63, %v2744_v11  ;;  %v1007_v33 = vadd.f32 %v991_v25, %v2746_v27  ;;  %v3645_v58 = vld [vmem:[#allocation97_spill] sm:$0xff]  ;;  %v3646_v19 = vld [vmem:[#allocation98_spill] sm:$0xff]  ;;  %v1026_v56 = vpop.permute.xlu1 %1025 }
 0x11c   :  { %v1008_v51 = vadd.f32 %v992_v29, %v2748_v26  ;;  %vm1027_vm0 = vcmp.lt.s32.totalorder %v1895_v20, %v1023_v46  ;;  %vm1028_vm1 = vcmp.lt.s32.totalorder %v1905_v28, %v1023_v46  ;;  %vm1029_vm2 = vcmp.lt.s32.totalorder %v1923_v36, %v1023_v46 }
 0x11d   :  { %vm1030_vm3 = vcmp.lt.s32.totalorder %v1926_v37, %v1023_v46  ;;  %vm1031_vm4 = vcmp.lt.s32.totalorder %v1929_v38, %v1023_v46  ;;  %vm1032_vm5 = vcmp.lt.s32.totalorder %v1932_v39, %v1023_v46  ;;  %vm1033_vm6 = vcmp.lt.s32.totalorder %v1935_v40, %v1023_v46 }
 0x11e   :  { %vm1034_vm7 = vcmp.lt.s32.totalorder %v1938_v41, %v1023_v46  ;;  %v1009_v30 = vadd.f32 %v993_v7, %v2758_v53  ;;  %v1010_v11 = vadd.f32 %v994_v18, %v2760_v61  ;;  %v1011_v27 = vadd.f32 %v995_v16, %v2762_v0  ;;  %v3641_v53 = vld [vmem:[#allocation93_spill] sm:$0xff]  ;;  %v3642_v61 = vld [vmem:[#allocation94_spill] sm:$0xff]  ;;  %v3647_v7 = vld [vmem:[#allocation99_spill] sm:$0xff] }
 0x11f   :  { %v1012_v26 = vadd.f32 %v996_v34, %v2764_v55  ;;  %v1075_v17 = vsel %vm1027_vm0, %v3635_v21, 0.0  ;;  %v1076_v42 = vsel %vm1028_vm1, %v3636_v60, 0.0  ;;  %v1077_v5 = vsel %vm1029_vm2, %v3637_v4, 0.0  ;;  %v3648_v16 = vld [vmem:[#allocation100_spill] sm:$0xff] }
 0x120   :  { %v1078_v62 = vsel %vm1030_vm3, %v3638_v6, 0.0  ;;  %v1079_v1 = vsel %vm1031_vm4, %v3639_v54, 0.0  ;;  %v1080_v52 = vsel %vm1032_vm5, %v3640_v8, 0.0  ;;  %v1081_v9 = vsel %vm1033_vm6, %v3641_v53, 0.0 }
 0x121   :  { %v1082_v44 = vsel %vm1034_vm7, %v3642_v61, 0.0  ;;  %vm1113_vm8 = vcmp.lt.s32.totalorder %v1895_v20, %v1109_v3  ;;  %vm1114_vm9 = vcmp.lt.s32.totalorder %v1905_v28, %v1109_v3  ;;  %vm1115_vm10 = vcmp.lt.s32.totalorder %v1923_v36, %v1109_v3 }
 0x122   :  { %vm1116_vm11 = vcmp.lt.s32.totalorder %v1926_v37, %v1109_v3  ;;  %v1091_v0 = vadd.f32 %v1075_v17, %v1005_v2  ;;  %v1092_v55 = vadd.f32 %v1076_v42, %v1006_v43  ;;  %v1093_v48 = vadd.f32 %v1077_v5, %v1007_v33  ;;  %v3649_v2 = vld [vmem:[#allocation101_spill] sm:$0xff]  ;;  %v1112_v5 = vpop.permute.xlu1 %1111 }
 0x123   :  { %v1094_v49 = vadd.f32 %v1078_v62, %v1008_v51  ;;  %vm1117_vm12 = vcmp.lt.s32.totalorder %v1929_v38, %v1109_v3  ;;  %vm1118_vm13 = vcmp.lt.s32.totalorder %v1932_v39, %v1109_v3  ;;  %vm1119_vm14 = vcmp.lt.s32.totalorder %v1935_v40, %v1109_v3 }
 0x124   :  { %vm1120_vm15 = vcmp.lt.s32.totalorder %v1938_v41, %v1109_v3  ;;  %v1161_v12 = vsel %vm1113_vm8, %v3643_v50, 0.0  ;;  %v1162_v23 = vsel %vm1114_vm9, %v3644_v13, 0.0  ;;  %v1163_v14 = vsel %vm1115_vm10, %v3645_v58, 0.0 }
 0x125   :  { %v1164_v22 = vsel %vm1116_vm11, %v3646_v19, 0.0  ;;  %v1095_v63 = vadd.f32 %v1079_v1, %v1009_v30  ;;  %v1096_v25 = vadd.f32 %v1080_v52, %v1010_v11  ;;  %v1097_v29 = vadd.f32 %v1081_v9, %v1011_v27 }
 0x126   :  { %v1098_v46 = vadd.f32 %v1082_v44, %v1012_v26  ;;  %v1165_v18 = vsel %vm1117_vm12, %v3647_v7, 0.0  ;;  %v1166_v34 = vsel %vm1118_vm13, %v3648_v16, 0.0  ;;  %v1167_v43 = vsel %vm1119_vm14, %v3649_v2, 0.0 }
 0x127   :  { %v1168_v33 = vsel %vm1120_vm15, %v2396_v15, 0.0  ;;  %v2886_v51 = vadd.f32 %v1161_v12, %v1091_v0  ;;  %v2888_v3 = vadd.f32 %v1162_v23, %v1092_v55  ;;  %v2890_v17 = vadd.f32 %v1163_v14, %v1093_v48 }
 0x128   :  { %v2892_v42 = vadd.f32 %v1164_v22, %v1094_v49  ;;  %vm1035_vm0 = vcmp.lt.s32.totalorder %v1895_v20, %v1026_v56  ;;  %vm1036_vm1 = vcmp.lt.s32.totalorder %v1905_v28, %v1026_v56  ;;  %vm1037_vm2 = vcmp.lt.s32.totalorder %v1923_v36, %v1026_v56  ;;  %v1198_v22 = vpop.permute.xlu0 %1197 }
 0x129   :  { %vm1038_vm3 = vcmp.lt.s32.totalorder %v1926_v37, %v1026_v56  ;;  %vm1039_vm4 = vcmp.lt.s32.totalorder %v1929_v38, %v1026_v56  ;;  %vm1040_vm5 = vcmp.lt.s32.totalorder %v1932_v39, %v1026_v56  ;;  %vm1041_vm6 = vcmp.lt.s32.totalorder %v1935_v40, %v1026_v56 }
 0x12a   :  { %vm1042_vm7 = vcmp.lt.s32.totalorder %v1938_v41, %v1026_v56  ;;  %v2902_v30 = vadd.f32 %v1165_v18, %v1095_v63  ;;  %v2904_v11 = vadd.f32 %v1166_v34, %v1096_v25  ;;  %v2906_v27 = vadd.f32 %v1167_v43, %v1097_v29  ;;  %v3651_v56 = vld [vmem:[#allocation56_spill] sm:$0xff]  ;;  %v3654_v29 = vld [vmem:[#allocation59_spill] sm:$0xff]  ;;  %v3656_v18 = vld [vmem:[#allocation61_spill] sm:$0xff] }
 0x12b   :  { %v2908_v26 = vadd.f32 %v1168_v33, %v1098_v46  ;;  %v1083_v62 = vsel %vm1035_vm0, %v3635_v21, 0.0  ;;  %v1084_v1 = vsel %vm1036_vm1, %v3636_v60, 0.0  ;;  %v1085_v52 = vsel %vm1037_vm2, %v3637_v4, 0.0  ;;  %v3657_v34 = vld [vmem:[#allocation62_spill] sm:$0xff] }
 0x12c   :  { %v1086_v9 = vsel %vm1038_vm3, %v3638_v6, 0.0  ;;  %v1087_v44 = vsel %vm1039_vm4, %v3639_v54, 0.0  ;;  %v1088_v0 = vsel %vm1040_vm5, %v3640_v8, 0.0  ;;  %v1089_v55 = vsel %vm1041_vm6, %v3641_v53, 0.0 }
 0x12d   :  { %v1090_v48 = vsel %vm1042_vm7, %v3642_v61, 0.0  ;;  %vm1121_vm8 = vcmp.lt.s32.totalorder %v1895_v20, %v1112_v5  ;;  %vm1122_vm9 = vcmp.lt.s32.totalorder %v1905_v28, %v1112_v5  ;;  %vm1123_vm10 = vcmp.lt.s32.totalorder %v1923_v36, %v1112_v5 }
 0x12e   :  { %vm1124_vm11 = vcmp.lt.s32.totalorder %v1926_v37, %v1112_v5  ;;  %v1099_v21 = vadd.f32 %v1083_v62, %v2818_v35  ;;  %v1100_v60 = vadd.f32 %v1084_v1, %v2820_v47  ;;  %v1101_v4 = vadd.f32 %v1085_v52, %v2822_v31  ;;  %v1195_v52 = vpop.permute.xlu1 %1194 }
 0x12f   :  { %v1102_v6 = vadd.f32 %v1086_v9, %v2824_v32  ;;  %vm1125_vm12 = vcmp.lt.s32.totalorder %v1929_v38, %v1112_v5  ;;  %vm1126_vm13 = vcmp.lt.s32.totalorder %v1932_v39, %v1112_v5  ;;  %vm1127_vm14 = vcmp.lt.s32.totalorder %v1935_v40, %v1112_v5 }
 0x130   :  { %vm1128_vm15 = vcmp.lt.s32.totalorder %v1938_v41, %v1112_v5  ;;  %v1169_v54 = vsel %vm1121_vm8, %v3643_v50, 0.0  ;;  %v1170_v8 = vsel %vm1122_vm9, %v3644_v13, 0.0  ;;  %v1171_v35 = vsel %vm1123_vm10, %v3645_v58, 0.0 }
 0x131   :  { %v1172_v47 = vsel %vm1124_vm11, %v3646_v19, 0.0  ;;  %v1103_v31 = vadd.f32 %v1087_v44, %v2834_v57  ;;  %v1104_v32 = vadd.f32 %v1088_v0, %v2836_v59  ;;  %v1105_v53 = vadd.f32 %v1089_v55, %v2838_v45  ;;  %v3650_v57 = vld [vmem:[#allocation23_spill] sm:$0xff]  ;;  %v3652_v45 = vld [vmem:[#allocation57_spill] sm:$0xff] }
 0x132   :  { %v1106_v61 = vadd.f32 %v1090_v48, %v2840_v24  ;;  %v1173_v49 = vsel %vm1125_vm12, %v3647_v7, 0.0  ;;  %v1174_v12 = vsel %vm1126_vm13, %v3648_v16, 0.0  ;;  %v1175_v50 = vsel %vm1127_vm14, %v3649_v2, 0.0  ;;  %v3653_v24 = vld [vmem:[#allocation58_spill] sm:$0xff]  ;;  %v3655_v7 = vld [vmem:[#allocation60_spill] sm:$0xff] }
 0x133   :  { %v1176_v13 = vsel %vm1128_vm15, %v2396_v15, 0.0  ;;  %v1185_v23 = vadd.f32 %v1169_v54, %v1099_v21  ;;  %v1186_v58 = vadd.f32 %v1170_v8, %v1100_v60  ;;  %v1187_v14 = vadd.f32 %v1171_v35, %v1101_v4 }
 0x134   :  { %v1188_v19 = vadd.f32 %v1172_v47, %v1102_v6  ;;  %v1218_v59 = vrot.slane %v3651_v56, %v3650_v57  ;;  %v1222_v63 = vrot.slane %v3652_v45, %v3650_v57  ;;  %v1226_v25 = vrot.slane %v3653_v24, %v3650_v57 }
 0x135   :  { %v1230_v46 = vrot.slane %v3654_v29, %v3650_v57  ;;  %v1234_v15 = vrot.slane %v3655_v7, %v3650_v57  ;;  %v1238_v16 = vrot.slane %v3656_v18, %v3650_v57  ;;  %v1242_v2 = vrot.slane %v3657_v34, %v3650_v57 }
 0x136   :  { %v1246_v43 = vrot.slane %v2196_v10, %v3650_v57  ;;  %vm1207_vm0 = vcmp.lt.s32.totalorder %v1895_v20, %v1198_v22  ;;  %vm1208_vm1 = vcmp.lt.s32.totalorder %v1905_v28, %v1198_v22  ;;  %vm1209_vm2 = vcmp.lt.s32.totalorder %v1923_v36, %v1198_v22 }
 0x137   :  { %vm1210_vm3 = vcmp.lt.s32.totalorder %v1926_v37, %v1198_v22  ;;  %vm1211_vm4 = vcmp.lt.s32.totalorder %v1929_v38, %v1198_v22  ;;  %vm1212_vm5 = vcmp.lt.s32.totalorder %v1932_v39, %v1198_v22  ;;  %vm1213_vm6 = vcmp.lt.s32.totalorder %v1935_v40, %v1198_v22 }
 0x138   :  { %vm1214_vm7 = vcmp.lt.s32.totalorder %v1938_v41, %v1198_v22  ;;  %v1189_v33 = vadd.f32 %v1173_v49, %v1103_v31  ;;  %v1190_v5 = vadd.f32 %v1174_v12, %v1104_v32  ;;  %v1191_v62 = vadd.f32 %v1175_v50, %v1105_v53 }
 0x139   :  { %v1192_v1 = vadd.f32 %v1176_v13, %v1106_v61  ;;  %v1255_v9 = vsel %vm1207_vm0, %v1218_v59, 0.0  ;;  %v1256_v44 = vsel %vm1208_vm1, %v1222_v63, 0.0  ;;  %v1257_v0 = vsel %vm1209_vm2, %v1226_v25, 0.0  ;;  %v1281_v13 = vpop.permute.xlu1 %1280 }
 0x13a   :  { %v1258_v55 = vsel %vm1210_vm3, %v1230_v46, 0.0  ;;  %v1259_v48 = vsel %vm1211_vm4, %v1234_v15, 0.0  ;;  %v1260_v21 = vsel %vm1212_vm5, %v1238_v16, 0.0  ;;  %v1261_v60 = vsel %vm1213_vm6, %v1242_v2, 0.0 }
 0x13b   :  { %v1262_v4 = vsel %vm1214_vm7, %v1246_v43, 0.0  ;;  %vm1199_vm8 = vcmp.lt.s32.totalorder %v1895_v20, %v1195_v52  ;;  %vm1200_vm9 = vcmp.lt.s32.totalorder %v1905_v28, %v1195_v52  ;;  %vm1201_vm10 = vcmp.lt.s32.totalorder %v1923_v36, %v1195_v52 }
 0x13c   :  { %vm1202_vm11 = vcmp.lt.s32.totalorder %v1926_v37, %v1195_v52  ;;  %vm1203_vm12 = vcmp.lt.s32.totalorder %v1929_v38, %v1195_v52  ;;  %vm1204_vm13 = vcmp.lt.s32.totalorder %v1932_v39, %v1195_v52  ;;  %vm1205_vm14 = vcmp.lt.s32.totalorder %v1935_v40, %v1195_v52 }
 0x13d   :  { %vm1206_vm15 = vcmp.lt.s32.totalorder %v1938_v41, %v1195_v52  ;;  %v2974_v6 = vadd.f32 %v1255_v9, %v1185_v23  ;;  %v2976_v54 = vadd.f32 %v1256_v44, %v1186_v58  ;;  %v2978_v8 = vadd.f32 %v1257_v0, %v1187_v14 }
 0x13e   :  { %v2980_v35 = vadd.f32 %v1258_v55, %v1188_v19  ;;  %v1247_v47 = vsel %vm1199_vm8, %v1218_v59, 0.0  ;;  %v1248_v31 = vsel %vm1200_vm9, %v1222_v63, 0.0  ;;  %v1249_v32 = vsel %vm1201_vm10, %v1226_v25, 0.0 }
 0x13f   :  { %v1250_v53 = vsel %vm1202_vm11, %v1230_v46, 0.0  ;;  %v1251_v61 = vsel %vm1203_vm12, %v1234_v15, 0.0  ;;  %v1252_v49 = vsel %vm1204_vm13, %v1238_v16, 0.0  ;;  %v1253_v12 = vsel %vm1205_vm14, %v1242_v2, 0.0 }
 0x140   :  { %v1254_v50 = vsel %vm1206_vm15, %v1246_v43, 0.0  ;;  %v2982_v22 = vadd.f32 %v1259_v48, %v1189_v33  ;;  %v2984_v57 = vadd.f32 %v1260_v21, %v1190_v5  ;;  %v2986_v23 = vadd.f32 %v1261_v60, %v1191_v62  ;;  %v1284_v43 = vpop.permute.xlu1 %1283 }
 0x141   :  { %v2988_v58 = vadd.f32 %v1262_v4, %v1192_v1  ;;  %v2991_v14 = vadd.f32 %v1247_v47, %v2886_v51  ;;  %v2994_v19 = vadd.f32 %v1248_v31, %v2888_v3  ;;  %v2997_v59 = vadd.f32 %v1249_v32, %v2890_v17  ;;  %v3666_v3 = vld [vmem:[#allocation24_spill] sm:$0xff] }
 0x142   :  { %v3000_v63 = vadd.f32 %v1250_v53, %v2892_v42  ;;  %v3003_v25 = vadd.f32 %v1251_v61, %v2902_v30  ;;  %v3006_v46 = vadd.f32 %v1252_v49, %v2904_v11  ;;  %v3009_v15 = vadd.f32 %v1253_v12, %v2906_v27  ;;  %v3675_v53 = vld [vmem:[#allocation12_spill] sm:$0xff]  ;;  %v3676_v49 = vld [vmem:[#allocation13_spill] sm:$0xff] }
 0x143   :  { %3658 = vst [vmem:[#allocation25_spill] sm:$0xff] %v2991_v14  ;;  %3659 = vst [vmem:[#allocation26_spill] sm:$0xff] %v2994_v19  ;;  %v3012_v51 = vadd.f32 %v1254_v50, %v2908_v26  ;;  %v1304_v16 = vrot.slane %v3651_v56, %v3666_v3  ;;  %v1308_v17 = vrot.slane %v3652_v45, %v3666_v3  ;;  %v3677_v50 = vld [vmem:[#allocation14_spill] sm:$0xff] }
 0x144   :  { %3660 = vst [vmem:[#allocation27_spill] sm:$0xff] %v2997_v59  ;;  %3661 = vst [vmem:[#allocation28_spill] sm:$0xff] %v3000_v63  ;;  %v1312_v42 = vrot.slane %v3653_v24, %v3666_v3  ;;  %v1316_v30 = vrot.slane %v3654_v29, %v3666_v3  ;;  %vm1285_vm0 = vcmp.lt.s32.totalorder %v1895_v20, %v1281_v13 }
 0x145   :  { %3662 = vst [vmem:[#allocation29_spill] sm:$0xff] %v3003_v25  ;;  %3663 = vst [vmem:[#allocation30_spill] sm:$0xff] %v3006_v46  ;;  %vm1286_vm1 = vcmp.lt.s32.totalorder %v1905_v28, %v1281_v13  ;;  %vm1287_vm2 = vcmp.lt.s32.totalorder %v1923_v36, %v1281_v13  ;;  %vm1288_vm3 = vcmp.lt.s32.totalorder %v1926_v37, %v1281_v13  ;;  %v3038_v33 = vsel %vm1285_vm0, %v1304_v16, 0.0 }
 0x146   :  { %3664 = vst [vmem:[#allocation32_spill] sm:$0xff] %v3009_v15  ;;  %3665 = vst [vmem:[#allocation33_spill] sm:$0xff] %v3012_v51  ;;  %v1320_v11 = vrot.slane %v3655_v7, %v3666_v3  ;;  %v1324_v27 = vrot.slane %v3656_v18, %v3666_v3  ;;  %v1328_v26 = vrot.slane %v3657_v34, %v3666_v3  ;;  %v3040_v5 = vsel %vm1286_vm1, %v1308_v17, 0.0 }
 0x147   :  { %v1332_v2 = vrot.slane %v2196_v10, %v3666_v3  ;;  %vm1289_vm4 = vcmp.lt.s32.totalorder %v1929_v38, %v1281_v13  ;;  %vm1290_vm5 = vcmp.lt.s32.totalorder %v1932_v39, %v1281_v13  ;;  %vm1291_vm6 = vcmp.lt.s32.totalorder %v1935_v40, %v1281_v13  ;;  %3667 = vst [vmem:[#allocation34_spill] sm:$0xff] %v3038_v33  ;;  %v3678_v3 = vld [vmem:[#allocation15_spill] sm:$0xff] }
 0x148   :  { %vm1292_vm7 = vcmp.lt.s32.totalorder %v1938_v41, %v1281_v13  ;;  %3668 = vst [vmem:[#allocation35_spill] sm:$0xff] %v3040_v5  ;;  %v3042_v62 = vsel %vm1287_vm2, %v1312_v42, 0.0  ;;  %v3044_v1 = vsel %vm1288_vm3, %v1316_v30, 0.0  ;;  %vm1293_vm8 = vcmp.lt.s32.totalorder %v1895_v20, %v1284_v43 }
 0x149   :  { %3669 = vst [vmem:[#allocation36_spill] sm:$0xff] %v3042_v62  ;;  %3670 = vst [vmem:[#allocation37_spill] sm:$0xff] %v3044_v1  ;;  %vm1294_vm9 = vcmp.lt.s32.totalorder %v1905_v28, %v1284_v43  ;;  %vm1295_vm10 = vcmp.lt.s32.totalorder %v1923_v36, %v1284_v43  ;;  %vm1296_vm11 = vcmp.lt.s32.totalorder %v1926_v37, %v1284_v43  ;;  %v3056_v52 = vsel %vm1289_vm4, %v1320_v11, 0.0 }
 0x14a   :  { %vm1297_vm12 = vcmp.lt.s32.totalorder %v1929_v38, %v1284_v43  ;;  %vm1298_vm13 = vcmp.lt.s32.totalorder %v1932_v39, %v1284_v43  ;;  %vm1299_vm14 = vcmp.lt.s32.totalorder %v1935_v40, %v1284_v43  ;;  %vm1300_vm15 = vcmp.lt.s32.totalorder %v1938_v41, %v1284_v43  ;;  %3671 = vst [vmem:[#allocation38_spill] sm:$0xff] %v3056_v52 }
 0x14b   :  { %v3060_v9 = vsel %vm1290_vm5, %v1324_v27, 0.0  ;;  %v3064_v44 = vsel %vm1291_vm6, %v1328_v26, 0.0  ;;  %v3068_v0 = vsel %vm1292_vm7, %v1332_v2, 0.0  ;;  %v3070_v55 = vsel %vm1293_vm8, %v1304_v16, 0.0 }
 0x14c   :  { %3672 = vst [vmem:[#allocation39_spill] sm:$0xff] %v3060_v9  ;;  %3673 = vst [vmem:[#allocation40_spill] sm:$0xff] %v3064_v44  ;;  %v3072_v48 = vsel %vm1294_vm9, %v1308_v17, 0.0  ;;  %v3074_v21 = vsel %vm1295_vm10, %v1312_v42, 0.0  ;;  %v3076_v60 = vsel %vm1296_vm11, %v1316_v30, 0.0  ;;  %v3078_v4 = vsel %vm1297_vm12, %v1320_v11, 0.0  ;;  %v3102_v9 = vpop.permute.xlu1 %1369 }
 0x14d   :  { %3674 = vst [vmem:[#allocation41_spill] sm:$0xff] %v3068_v0  ;;  %v3080_v47 = vsel %vm1298_vm13, %v1324_v27, 0.0  ;;  %v3082_v31 = vsel %vm1299_vm14, %v1328_v26, 0.0  ;;  %v3084_v32 = vsel %vm1300_vm15, %v1332_v2, 0.0  ;;  %v105_v61 = vadd.f32 %v3651_v56, %v3675_v53  ;;  %v3679_v17 = vld [vmem:[#allocation16_spill] sm:$0xff]  ;;  %v3680_v30 = vld [vmem:[#allocation17_spill] sm:$0xff] }
 0x14e   :  { %v112_v12 = vadd.f32 %v3652_v45, %v3676_v49  ;;  %v119_v13 = vadd.f32 %v3653_v24, %v3677_v50  ;;  %v126_v16 = vadd.f32 %v3654_v29, %v3678_v3  ;;  %v133_v42 = vadd.f32 %v3655_v7, %v3679_v17  ;;  %v3681_v27 = vld [vmem:[#allocation18_spill] sm:$0xff]  ;;  %v3682_v2 = vld [vmem:[#allocation19_spill] sm:$0xff] }
 0x14f   :  { %v140_v11 = vadd.f32 %v3656_v18, %v3680_v30  ;;  %v147_v26 = vadd.f32 %v3657_v34, %v3681_v27  ;;  %v154_v43 = vadd.f32 %v2196_v10, %v3682_v2  ;;  %v106_v53 = vrot.slane %v105_v61, 4 }
 0x150   :  { %v113_v49 = vrot.slane %v112_v12, 4  ;;  %v120_v0 = vrot.slane %v119_v13, 4  ;;  %v127_v51 = vrot.slane %v126_v16, 4  ;;  %v134_v50 = vrot.slane %v133_v42, 4 }
 0x151   :  { %v141_v44 = vrot.slane %v140_v11, 4  ;;  %v148_v15 = vrot.slane %v147_v26, 4  ;;  %v155_v3 = vrot.slane %v154_v43, 4  ;;  %v107_v17 = vadd.f32 %v106_v53, %v105_v61 }
 0x152   :  { %v114_v46 = vadd.f32 %v113_v49, %v112_v12  ;;  %v121_v52 = vadd.f32 %v120_v0, %v119_v13  ;;  %v128_v30 = vadd.f32 %v127_v51, %v126_v16  ;;  %v135_v25 = vadd.f32 %v134_v50, %v133_v42 }
 0x153   :  { %v142_v1 = vadd.f32 %v141_v44, %v140_v11  ;;  %v149_v27 = vadd.f32 %v148_v15, %v147_v26  ;;  %v156_v63 = vadd.f32 %v155_v3, %v154_v43  ;;  %v108_v62 = vrot.slane %v107_v17, 2 }
 0x154   :  { %v115_v2 = vrot.slane %v114_v46, 2  ;;  %v122_v59 = vrot.slane %v121_v52, 2  ;;  %v129_v5 = vrot.slane %v128_v30, 2  ;;  %vm1379_vm0 = vcmp.lt.s32.totalorder %v1895_v20, %v3102_v9 }
 0x155   :  { %vm1380_vm1 = vcmp.lt.s32.totalorder %v1905_v28, %v3102_v9  ;;  %vm1381_vm2 = vcmp.lt.s32.totalorder %v1923_v36, %v3102_v9  ;;  %vm1382_vm3 = vcmp.lt.s32.totalorder %v1926_v37, %v3102_v9  ;;  %v136_v51 = vrot.slane %v135_v25, 2 }
 0x156   :  { %v143_v44 = vrot.slane %v142_v1, 2  ;;  %v150_v15 = vrot.slane %v149_v27, 2  ;;  %v157_v0 = vrot.slane %v156_v63, 2  ;;  %vm1383_vm4 = vcmp.lt.s32.totalorder %v1929_v38, %v3102_v9 }
 0x157   :  { %vm1384_vm5 = vcmp.lt.s32.totalorder %v1932_v39, %v3102_v9  ;;  %vm1385_vm6 = vcmp.lt.s32.totalorder %v1935_v40, %v3102_v9  ;;  %vm1386_vm7 = vcmp.lt.s32.totalorder %v1938_v41, %v3102_v9  ;;  %v109_v61 = vadd.f32 %v108_v62, %v107_v17 }
 0x158   :  { %v116_v12 = vadd.f32 %v115_v2, %v114_v46  ;;  %v123_v13 = vadd.f32 %v122_v59, %v121_v52  ;;  %v130_v16 = vadd.f32 %v129_v5, %v128_v30  ;;  %v137_v42 = vadd.f32 %v136_v51, %v135_v25  ;;  %v3686_v51 = vld [vmem:[#allocation22_spill] sm:$0xff] }
 0x159   :  { %v144_v11 = vadd.f32 %v143_v44, %v142_v1  ;;  %v151_v26 = vadd.f32 %v150_v15, %v149_v27  ;;  %v158_v43 = vadd.f32 %v157_v0, %v156_v63  ;;  %v110_v53 = vrot.slane %v109_v61, 1  ;;  %v3685_v27 = vld [vmem:[#allocation21_spill] sm:$0xff] }
 0x15a   :  { %v117_v49 = vrot.slane %v116_v12, 1  ;;  %v124_v50 = vrot.slane %v123_v13, 1  ;;  %v131_v3 = vrot.slane %v130_v16, 1  ;;  %v138_v19 = vrot.slane %v137_v42, 1 }
 0x15b   :  { %v145_v33 = vrot.slane %v144_v11, 1  ;;  %v152_v14 = vrot.slane %v151_v26, 1  ;;  %v159_v39 = vrot.slane %v158_v43, 1  ;;  %v3120_v40 = vadd.f32 %v110_v53, %v109_v61  ;;  %v3687_v53 = vld [vmem:[#allocation51_spill] sm:$0xff] }
 0x15c   :  { %v3122_v38 = vadd.f32 %v117_v49, %v116_v12  ;;  %v3124_v62 = vadd.f32 %v124_v50, %v123_v13  ;;  %v3126_v59 = vadd.f32 %v131_v3, %v130_v16  ;;  %v3128_v25 = vadd.f32 %v138_v19, %v137_v42 }
 0x15d   :  { %v3130_v46 = vadd.f32 %v145_v33, %v144_v11  ;;  %v3132_v63 = vadd.f32 %v152_v14, %v151_v26  ;;  %v3134_v5 = vadd.f32 %v159_v39, %v158_v43  ;;  %v1357_v1 = vadd.f32 %v3070_v55, %v2974_v6  ;;  %v3683_v33 = vld [vmem:[#allocation31_spill] sm:$0xff] }
 0x15e   :  { %v1358_v52 = vadd.f32 %v3072_v48, %v2976_v54  ;;  %v1359_v17 = vadd.f32 %v3074_v21, %v2978_v8  ;;  %v1360_v30 = vadd.f32 %v3076_v60, %v2980_v35  ;;  %v1361_v19 = vadd.f32 %v3078_v4, %v2982_v22 }
 0x15f   :  { %v1362_v14 = vadd.f32 %v3080_v47, %v2984_v57  ;;  %v1363_v39 = vadd.f32 %v3082_v31, %v2986_v23  ;;  %v1364_v6 = vadd.f32 %v3084_v32, %v2988_v58  ;;  %v3154_v54 = vrot.slane %v3651_v56, %v3683_v33  ;;  %v3168_v57 = vpop.permute.xlu0 %1366  ;;  %v3684_v31 = vld [vmem:[#allocation20_spill] sm:$0xff] }
 0x160   :  { %v3158_v8 = vrot.slane %v3652_v45, %v3683_v33  ;;  %v3162_v35 = vrot.slane %v3653_v24, %v3683_v33  ;;  %v3166_v22 = vrot.slane %v3654_v29, %v3683_v33  ;;  %v3172_v23 = vrot.slane %v3655_v7, %v3683_v33 }
 0x161   :  { %v3176_v58 = vrot.slane %v3656_v18, %v3683_v33  ;;  %v3180_v55 = vrot.slane %v3657_v34, %v3683_v33  ;;  %v3184_v48 = vrot.slane %v2196_v10, %v3683_v33  ;;  %v1427_v21 = vsel %vm1379_vm0, %v3154_v54, 0.0 }
 0x162   :  { %v1428_v60 = vsel %vm1380_vm1, %v3158_v8, 0.0  ;;  %v1429_v4 = vsel %vm1381_vm2, %v3162_v35, 0.0  ;;  %v1430_v47 = vsel %vm1382_vm3, %v3166_v22, 0.0  ;;  %v1431_v32 = vsel %vm1383_vm4, %v3172_v23, 0.0 }
 0x163   :  { %v1432_v2 = vsel %vm1384_vm5, %v3176_v58, 0.0  ;;  %v1433_v44 = vsel %vm1385_vm6, %v3180_v55, 0.0  ;;  %v1434_v15 = vsel %vm1386_vm7, %v3184_v48, 0.0  ;;  %v1443_v0 = vadd.f32 %v1427_v21, %v1357_v1  ;;  %v1456_v43 = vpop.permute.xlu0 %1455 }
 0x164   :  { %v1444_v61 = vadd.f32 %v1428_v60, %v1358_v52  ;;  %v1445_v12 = vadd.f32 %v1429_v4, %v1359_v17  ;;  %v1446_v13 = vadd.f32 %v1430_v47, %v1360_v30  ;;  %v1447_v16 = vadd.f32 %v1431_v32, %v1361_v19 }
 0x165   :  { %v1448_v42 = vadd.f32 %v1432_v2, %v1362_v14  ;;  %v1449_v11 = vadd.f32 %v1433_v44, %v1363_v39  ;;  %v1450_v26 = vadd.f32 %v1434_v15, %v1364_v6  ;;  %v3220_v49 = vrot.slane %v3651_v56, %v3687_v53 }
 0x166   :  { %v3224_v50 = vrot.slane %v3652_v45, %v3687_v53  ;;  %v3228_v9 = vrot.slane %v3653_v24, %v3687_v53  ;;  %v3232_v3 = vrot.slane %v3654_v29, %v3687_v53  ;;  %v3236_v1 = vrot.slane %v3655_v7, %v3687_v53 }
 0x167   :  { %v3240_v56 = vrot.slane %v3656_v18, %v3687_v53  ;;  %v3244_v45 = vrot.slane %v3657_v34, %v3687_v53  ;;  %v3248_v24 = vrot.slane %v2196_v10, %v3687_v53  ;;  %vm1465_vm8 = vcmp.lt.s32.totalorder %v1895_v20, %v1456_v43 }
 0x168   :  { %vm1466_vm9 = vcmp.lt.s32.totalorder %v1905_v28, %v1456_v43  ;;  %vm1467_vm10 = vcmp.lt.s32.totalorder %v1923_v36, %v1456_v43  ;;  %vm1468_vm11 = vcmp.lt.s32.totalorder %v1926_v37, %v1456_v43  ;;  %vm1371_vm12 = vcmp.lt.s32.totalorder %v1895_v20, %v3168_v57 }
 0x169   :  { %3688 = vst [vmem:[#allocation42_spill] sm:$0xff] %v3240_v56  ;;  %3689 = vst [vmem:[#allocation43_spill] sm:$0xff] %v3244_v45  ;;  %vm1372_vm13 = vcmp.lt.s32.totalorder %v1905_v28, %v3168_v57  ;;  %vm1373_vm14 = vcmp.lt.s32.totalorder %v1923_v36, %v3168_v57  ;;  %vm1374_vm15 = vcmp.lt.s32.totalorder %v1926_v37, %v3168_v57  ;;  %v1513_v10 = vsel %vm1465_vm8, %v3220_v49, 0.0 }
 0x16a   :  { %3690 = vst [vmem:[#allocation44_spill] sm:$0xff] %v3248_v24  ;;  %vm1469_vm0 = vcmp.lt.s32.totalorder %v3684_v31, %v1456_v43  ;;  %vm1470_vm1 = vcmp.lt.s32.totalorder %v3685_v27, %v1456_v43  ;;  %vm1471_vm2 = vcmp.lt.s32.totalorder %v3686_v51, %v1456_v43  ;;  %vm1472_vm3 = vcmp.lt.s32.totalorder %v1938_v41, %v1456_v43 }
 0x16b   :  { %vm1375_vm4 = vcmp.lt.s32.totalorder %v3684_v31, %v3168_v57  ;;  %vm1376_vm5 = vcmp.lt.s32.totalorder %v3685_v27, %v3168_v57  ;;  %vm1377_vm6 = vcmp.lt.s32.totalorder %v3686_v51, %v3168_v57  ;;  %vm1378_vm7 = vcmp.lt.s32.totalorder %v1938_v41, %v3168_v57 }
 0x16c   :  { %v1514_v29 = vsel %vm1466_vm9, %v3224_v50, 0.0  ;;  %v1515_v7 = vsel %vm1467_vm10, %v3228_v9, 0.0  ;;  %v1516_v18 = vsel %vm1468_vm11, %v3232_v3, 0.0  ;;  %v1517_v34 = vsel %vm1469_vm0, %v3236_v1, 0.0 }
 0x16d   :  { %v1518_v52 = vsel %vm1470_vm1, %v3240_v56, 0.0  ;;  %v1519_v17 = vsel %vm1471_vm2, %v3244_v45, 0.0  ;;  %v1520_v30 = vsel %vm1472_vm3, %v3248_v24, 0.0  ;;  %v1529_v19 = vadd.f32 %v1513_v10, %v1443_v0 }
 0x16e   :  { %v1530_v14 = vadd.f32 %v1514_v29, %v1444_v61  ;;  %v1531_v39 = vadd.f32 %v1515_v7, %v1445_v12  ;;  %v1532_v6 = vadd.f32 %v1516_v18, %v1446_v13  ;;  %v1533_v33 = vadd.f32 %v1517_v34, %v1447_v16  ;;  %v3693_v29 = vld [vmem:[#allocation26_spill] sm:$0xff]  ;;  %v3694_v7 = vld [vmem:[#allocation35_spill] sm:$0xff] }
 0x16f   :  { %v1534_v21 = vadd.f32 %v1518_v52, %v1448_v42  ;;  %v1535_v60 = vadd.f32 %v1519_v17, %v1449_v11  ;;  %v1536_v4 = vadd.f32 %v1520_v30, %v1450_v26  ;;  %v1561_v47 = vmul.f32 2.0, %v1529_v19  ;;  %v3691_v11 = vld [vmem:[#allocation25_spill] sm:$0xff]  ;;  %v3692_v26 = vld [vmem:[#allocation34_spill] sm:$0xff]  ;;  %v3695_v34 = vld [vmem:[#allocation27_spill] sm:$0xff] }
 0x170   :  { %v1562_v32 = vmul.f32 2.0, %v1530_v14  ;;  %v1563_v2 = vmul.f32 2.0, %v1531_v39  ;;  %v1564_v44 = vmul.f32 2.0, %v1532_v6  ;;  %v1565_v15 = vmul.f32 2.0, %v1533_v33  ;;  %v3696_v52 = vld [vmem:[#allocation36_spill] sm:$0xff]  ;;  %v3698_v19 = vld [vmem:[#allocation37_spill] sm:$0xff] }
 0x171   :  { %v1566_v43 = vmul.f32 2.0, %v1534_v21  ;;  %v1567_v53 = vmul.f32 2.0, %v1535_v60  ;;  %v1568_v56 = vmul.f32 2.0, %v1536_v4  ;;  %v1593_v45 = vsub.f32 %v1561_v47, %v3120_v40  ;;  %v3697_v30 = vld [vmem:[#allocation28_spill] sm:$0xff]  ;;  %v3701_v39 = vld [vmem:[#allocation30_spill] sm:$0xff]  ;;  %v3702_v6 = vld [vmem:[#allocation39_spill] sm:$0xff] }
 0x172   :  { %v1594_v24 = vsub.f32 %v1562_v32, %v3122_v38  ;;  %v1595_v0 = vsub.f32 %v1563_v2, %v3124_v62  ;;  %v1596_v61 = vsub.f32 %v1564_v44, %v3126_v59  ;;  %v1597_v12 = vsub.f32 %v1565_v15, %v3128_v25  ;;  %v3703_v21 = vld [vmem:[#allocation32_spill] sm:$0xff]  ;;  %v3705_v47 = vld [vmem:[#allocation33_spill] sm:$0xff] }
 0x173   :  { %v1598_v13 = vsub.f32 %v1566_v43, %v3130_v46  ;;  %v1599_v16 = vsub.f32 %v1567_v53, %v3132_v63  ;;  %v1600_v42 = vsub.f32 %v1568_v56, %v3134_v5  ;;  %1644 = vst [vmem:[#allocation8 + $0x40] sm:$0xff] %v1593_v45  ;;  %v1349_v10 = vadd.f32 %v3692_v26, %v3691_v11  ;;  %v3699_v56 = vld [vmem:[#allocation29_spill] sm:$0xff]  ;;  %v3700_v45 = vld [vmem:[#allocation38_spill] sm:$0xff]  ;;  %v3704_v60 = vld [vmem:[#allocation40_spill] sm:$0xff] }
 0x174   :  { %1645 = vst [vmem:[#allocation8 + $0x48] sm:$0xff] %v1594_v24  ;;  %1646 = vst [vmem:[#allocation8 + $0x50] sm:$0xff] %v1595_v0  ;;  %v1350_v18 = vadd.f32 %v3694_v7, %v3693_v29  ;;  %v1351_v17 = vadd.f32 %v3696_v52, %v3695_v34  ;;  %v1352_v14 = vadd.f32 %v3698_v19, %v3697_v30  ;;  %v3706_v32 = vld [vmem:[#allocation41_spill] sm:$0xff]  ;;  %v1419_v44 = vsel %vm1371_vm12, %v3154_v54, 0.0  ;;  %v1453_v0 = vpop.permute.xlu1 %1452 }
 0x175   :  { %1647 = vst [vmem:[#allocation8 + $0x58] sm:$0xff] %v1596_v61  ;;  %1648 = vst [vmem:[#allocation8 + $0x60] sm:$0xff] %v1597_v12  ;;  %v1353_v24 = vadd.f32 %v3700_v45, %v3699_v56  ;;  %v1354_v33 = vadd.f32 %v3702_v6, %v3701_v39  ;;  %v1355_v4 = vadd.f32 %v3704_v60, %v3703_v21  ;;  %v1420_v15 = vsel %vm1372_vm13, %v3158_v8, 0.0 }
 0x176   :  { %1649 = vst [vmem:[#allocation8 + $0x68] sm:$0xff] %v1598_v13  ;;  %1650 = vst [vmem:[#allocation8 + $0x70] sm:$0xff] %v1599_v16  ;;  %v1356_v2 = vadd.f32 %v3706_v32, %v3705_v47  ;;  %v1421_v43 = vsel %vm1373_vm14, %v3162_v35, 0.0  ;;  %v1422_v53 = vsel %vm1374_vm15, %v3166_v22, 0.0  ;;  %v1423_v54 = vsel %vm1375_vm4, %v3172_v23, 0.0 }
 0x177   :  { %1651 = vst [vmem:[#allocation8 + $0x78] sm:$0xff] %v1600_v42  ;;  %v1424_v8 = vsel %vm1376_vm5, %v3176_v58, 0.0  ;;  %v1425_v35 = vsel %vm1377_vm6, %v3180_v55, 0.0  ;;  %v1426_v22 = vsel %vm1378_vm7, %v3184_v48, 0.0  ;;  %v1435_v61 = vadd.f32 %v1419_v44, %v1349_v10  ;;  %v3707_v55 = vld [vmem:[#allocation42_spill] sm:$0xff]  ;;  %v3708_v48 = vld [vmem:[#allocation43_spill] sm:$0xff] }
 0x178   :  { %v1436_v12 = vadd.f32 %v1420_v15, %v1350_v18  ;;  %v1437_v13 = vadd.f32 %v1421_v43, %v1351_v17  ;;  %v1438_v16 = vadd.f32 %v1422_v53, %v1352_v14  ;;  %v1439_v23 = vadd.f32 %v1423_v54, %v1353_v24  ;;  %v3709_v10 = vld [vmem:[#allocation44_spill] sm:$0xff] }
 0x179   :  { %v1440_v42 = vadd.f32 %v1424_v8, %v1354_v33  ;;  %v1441_v11 = vadd.f32 %v1425_v35, %v1355_v4  ;;  %v1442_v26 = vadd.f32 %v1426_v22, %v1356_v2  ;;  %vm1457_vm8 = vcmp.lt.s32.totalorder %v1895_v20, %v1453_v0 }
 0x17a   :  { %vm1458_vm9 = vcmp.lt.s32.totalorder %v1905_v28, %v1453_v0  ;;  %vm1459_vm10 = vcmp.lt.s32.totalorder %v1923_v36, %v1453_v0  ;;  %vm1460_vm11 = vcmp.lt.s32.totalorder %v1926_v37, %v1453_v0  ;;  %vm1461_vm12 = vcmp.lt.s32.totalorder %v3684_v31, %v1453_v0 }
 0x17b   :  { %vm1462_vm13 = vcmp.lt.s32.totalorder %v3685_v27, %v1453_v0  ;;  %vm1463_vm14 = vcmp.lt.s32.totalorder %v3686_v51, %v1453_v0  ;;  %vm1464_vm15 = vcmp.lt.s32.totalorder %v1938_v41, %v1453_v0  ;;  %v1505_v57 = vsel %vm1457_vm8, %v3220_v49, 0.0 }
 0x17c   :  { %v1506_v58 = vsel %vm1458_vm9, %v3224_v50, 0.0  ;;  %v1507_v20 = vsel %vm1459_vm10, %v3228_v9, 0.0  ;;  %v1508_v28 = vsel %vm1460_vm11, %v3232_v3, 0.0  ;;  %v1509_v36 = vsel %vm1461_vm12, %v3236_v1, 0.0 }
 0x17d   :  { %v1510_v37 = vsel %vm1462_vm13, %v3707_v55, 0.0  ;;  %v1511_v31 = vsel %vm1463_vm14, %v3708_v48, 0.0  ;;  %v1512_v27 = vsel %vm1464_vm15, %v3709_v10, 0.0  ;;  %v1521_v29 = vadd.f32 %v1505_v57, %v1435_v61 }
 0x17e   :  { %v1522_v51 = vadd.f32 %v1506_v58, %v1436_v12  ;;  %v1523_v7 = vadd.f32 %v1507_v20, %v1437_v13  ;;  %v1524_v41 = vadd.f32 %v1508_v28, %v1438_v16  ;;  %v1525_v18 = vadd.f32 %v1509_v36, %v1439_v23 }
 0x17f   :  { %v1526_v49 = vadd.f32 %v1510_v37, %v1440_v42  ;;  %v1527_v34 = vadd.f32 %v1511_v31, %v1441_v11  ;;  %v1528_v50 = vadd.f32 %v1512_v27, %v1442_v26  ;;  %v1553_v52 = vmul.f32 2.0, %v1521_v29 }
 0x180   :  { %v1554_v9 = vmul.f32 2.0, %v1522_v51  ;;  %v1555_v17 = vmul.f32 2.0, %v1523_v7  ;;  %v1556_v3 = vmul.f32 2.0, %v1524_v41  ;;  %v1557_v1 = vmul.f32 2.0, %v1525_v18 }
 0x181   :  { %v1558_v30 = vmul.f32 2.0, %v1526_v49  ;;  %v1559_v19 = vmul.f32 2.0, %v1527_v34  ;;  %v1560_v14 = vmul.f32 2.0, %v1528_v50  ;;  %v1585_v56 = vsub.f32 %v1553_v52, %v3120_v40 }
 0x182   :  { %v1586_v45 = vsub.f32 %v1554_v9, %v3122_v38  ;;  %v1587_v24 = vsub.f32 %v1555_v17, %v3124_v62  ;;  %v1588_v39 = vsub.f32 %v1556_v3, %v3126_v59  ;;  %v1589_v6 = vsub.f32 %v1557_v1, %v3128_v25 }
 0x183   :  { %v1590_v33 = vsub.f32 %v1558_v30, %v3130_v46  ;;  %v1591_v21 = vsub.f32 %v1559_v19, %v3132_v63  ;;  %v1592_v60 = vsub.f32 %v1560_v14, %v3134_v5  ;;  %1636 = vst [vmem:[#allocation8] sm:$0xff] %v1585_v56 }
 0x184   :  { %1637 = vst [vmem:[#allocation8 + $0x8] sm:$0xff] %v1586_v45  ;;  %1638 = vst [vmem:[#allocation8 + $0x10] sm:$0xff] %v1587_v24 }
 0x185   :  { %1639 = vst [vmem:[#allocation8 + $0x18] sm:$0xff] %v1588_v39  ;;  %1640 = vst [vmem:[#allocation8 + $0x20] sm:$0xff] %v1589_v6 }
 0x186   :  { %1641 = vst [vmem:[#allocation8 + $0x28] sm:$0xff] %v1590_v33  ;;  %1642 = vst [vmem:[#allocation8 + $0x30] sm:$0xff] %v1591_v21 }
 0x187   :  { %1643 = vst [vmem:[#allocation8 + $0x38] sm:$0xff] %v1592_v60 }
 0x188   :  { %1776 = shalt.err (!%p1773_p6)
}
 0x189   :  { %s1777_s12 = scalar_lea.hbm %s3384_s2, 2048 }
 0x18a   :  { %p1778_p7 = scmp.ne.s32.totalorder %s3384_s2, %s1777_s12  ;;  %p1781_p8 = scmp.lt.u32.totalorder %s1777_s12, %s3384_s2 }
 0x18c   :  { %p1783_p9 = pnand %p1781_p8, %p1778_p7 }
 0x18e   :  { %1786 = shalt.err (!%p1783_p9)
}
 0x18f   :  { %s1816_s17 = smov 1024   ;;  %s1817_s18 = smov 64  }
 0x190   :  { %1663 = dma.vmem_to_hbm [thread:$0]  %s1658_s8, 2048, %s3384_s2, [#allocation5], %s1816_s17, %s1816_s17, %s1817_s18  }
 0x191   :  { %1791 = dma.done.wait [#allocation5], 2048  }
 0x192   :  { %1792 = vsyncadd [#allocation5], 4294965248 }
 0x193   :  { %1667 = vsyncpa [#allocation4], 1 }
 0x194   :  { %1668 = vsyncpa [#allocation7], 1 }
 0x195   :  { %1669 = vsyncpa [#allocation5], 1 }

</bundles_post_ra>
